<compile_context>
chip_gen: v5e
topology: v5e:2x2
jax: 0.10.0
libtpu: 0.0.40
codegen_flags: <defaults>
</compile_context>

<pallas_src>
import math

import jax
import jax.numpy as jnp
from jax.experimental import pallas as pl
from jax.experimental.pallas import tpu as pltpu

NEG_SLOPE = 0.1           # nanodet act_layers("LeakyReLU") -> negative_slope=0.1
BN_EPS = 1e-5
MM_DTYPE = jnp.bfloat16   # MXU-native matmul operand dtype (accumulate in f32)


# ----------------------------------------------------------------------------
# Host-side helpers: tap shifts and mask-folded depthwise tap weights
# ----------------------------------------------------------------------------
def _tap_shifts(k, H, W):
    """Static lane-rotation amount for each of the k*k taps."""
    HW = H * W
    p = k // 2
    shifts = []
    for di in range(k):
        for dj in range(k):
            r, c = di - p, dj - p
            # out[n] needs x[n + r*W + c]; with roll semantics
            # res[i] = x[(i - shift) mod HW] that is shift = -(r*W + c).
            shifts.append((-(r * W + c)) % HW)
    return shifts


def _masked_tap_weights(wd, k, H, W):
    """Fold the 'SAME' zero-padding boundary mask into the tap weights.

    wd: (k*k, C, 1) per-tap per-channel depthwise weights (BN already folded).
    Returns (k*k, C, H*W) f32: weight broadcast over lanes, zeroed on lanes
    whose shifted source pixel falls outside the image.  Removes one vsel per
    tap per vreg from the VALU-bound in-kernel dwconv.
    """
    HW = H * W
    lin = jnp.arange(HW, dtype=jnp.int32)
    hh, ww = lin // W, lin % W
    p = k // 2
    masks = []
    for di in range(k):
        for dj in range(k):
            r, c = di - p, dj - p
            m = jnp.ones((HW,), jnp.bool_)
            if r > 0:
                m = m & (hh < H - r)
            elif r < 0:
                m = m & (hh >= -r)
            if c > 0:
                m = m & (ww < W - c)
            elif c < 0:
                m = m & (ww >= -c)
            masks.append(m)
    mask = jnp.stack(masks, axis=0).astype(jnp.float32)          # (k*k, HW)
    return wd.astype(jnp.float32) * mask[:, None, :]             # (k*k, C, HW)


# ----------------------------------------------------------------------------
# Pallas kernel: one full GhostBottleneck (ghost1 -> ghost2 -> + shortcut)
# ----------------------------------------------------------------------------
def _make_bottleneck_kernel(H, W, Cin, Cout, mid, dw_k,
                            use_shortcut_conv, use_res):
    HW = H * W
    init1 = math.ceil(mid / 2)       # ghost1 primary channels
    cheap1 = mid - init1             # ghost1 cheap channels actually used
    init2 = math.ceil(Cout / 2)      # ghost2 primary channels
    cheap2 = Cout - init2            # ghost2 cheap channels actually used

    shifts3 = _tap_shifts(3, H, W)
    shiftsk = _tap_shifts(dw_k, H, W)

    def leaky(v):
        # max(v, slope*v) == LeakyReLU(v) exactly for 0 < slope < 1 (mul+max,
        # no compare/select).
        return jnp.maximum(v, v * NEG_SLOPE)

    def dwconv(x, wm_ref, shifts):
        # x: (C, HW) f32; wm_ref: (k*k, C, HW) mask-folded tap weights (f32).
        # Each tap: XLU lane rotation + one VPU mul; pairwise tree reduction
        # so the 4-wide VALU can fill its slots (important for the 25-tap
        # 5x5 shortcut path).
        terms = []
        for t, shift in enumerate(shifts):
            v = x if shift == 0 else pltpu.roll(x, shift=shift, axis=1)
            terms.append(v * wm_ref[t])
        while len(terms) > 1:
            nxt = [terms[i] + terms[i + 1] for i in range(0, len(terms) - 1, 2)]
            if len(terms) % 2:
                nxt.append(terms[-1])
            terms = nxt
        return terms[0]

    def kernel(*refs):
        x_ref = refs[0]
        w1, b1, d1m, bd1, w2a, w2b, b2, d2m, bd2 = refs[1:10]
        idx = 10
        if use_shortcut_conv:
            dsm, bds, ws, bs = refs[idx:idx + 4]
            idx += 4
        out_ref = refs[idx]

        x = x_ref[...].astype(jnp.float32)            # (Cin, HW)
        x_mm = x.astype(MM_DTYPE)

        # ---- ghost1 primary 1x1 (+ fused reduce_conv rows when use_res) ----
        z = jnp.dot(w1[...].astype(MM_DTYPE), x_mm,
                    preferred_element_type=jnp.float32) + b1[...]
        z = leaky(z)
        if use_res:
            x1, res = z[:init1], z[init1:]
        else:
            x1 = z

        # ---- ghost1 cheap op: depthwise 3x3 + LeakyReLU ----
        x2 = leaky(dwconv(x1, d1m, shifts3) + bd1[...])

        # ---- ghost2 primary 1x1 (linear): split-K dot over the two ghost1
        #      halves (channel concat never materialised) ----
        y1 = jnp.dot(w2a[...].astype(MM_DTYPE), x1.astype(MM_DTYPE),
                     preferred_element_type=jnp.float32) + b2[...]
        if cheap1 > 0:
            y1 = y1 + jnp.dot(w2b[...].astype(MM_DTYPE),
                              x2[:cheap1].astype(MM_DTYPE),
                              preferred_element_type=jnp.float32)

        # ---- ghost2 cheap op: depthwise 3x3 (linear) ----
        y2 = dwconv(y1, d2m, shifts3) + bd2[...]

        # ---- shortcut branch ----
        if use_shortcut_conv:
            s = dwconv(x, dsm, shiftsk) + bds[...]
            sc = jnp.dot(ws[...].astype(MM_DTYPE), s.astype(MM_DTYPE),
                         preferred_element_type=jnp.float32) + bs[...]
        else:
            sc = x                                    # Cin == Cout, stride 1
        if use_res:
            sc = sc + res

        # out = concat([y1, y2])[:Cout] + shortcut, written per channel range
        # -> lane-dense stores, no channel concat.
        out_ref[pl.ds(0, init2), :] = (y1 + sc[:init2]).astype(out_ref.dtype)
        if cheap2 > 0:
            out_ref[pl.ds(init2, cheap2), :] = (
                y2[:cheap2] + sc[init2:Cout]).astype(out_ref.dtype)

    return kernel


def _full_spec(a):
    nd = a.ndim
    return pl.BlockSpec(a.shape, lambda n, _nd=nd: (0,) * _nd)


def ghost_bottleneck_pallas(x_ncl, H, W, params, Cout, dw_k, use_res,
                            res_params=None, out_dtype=jnp.float32):
    """One GhostBottleneck on a lane-dense (N, Cin, H*W) activation."""
    N, Cin, HW = x_ncl.shape
    assert HW == H * W
    mid = params["mid"]
    init1 = math.ceil(mid / 2)
    cheap1 = mid - init1
    use_shortcut_conv = Cin != Cout

    w1, b1, d1, bd1 = params["ghost1"]
    w2, b2, d2, bd2 = params["ghost2"]

    # Fuse the optional reduce_conv 1x1 into the ghost1 primary matmul: both
    # consume x and both apply LeakyReLU, so just stack their output channels.
    if use_res:
        wr, br = res_params
        w1 = jnp.concatenate([w1, wr], axis=0)
        b1 = jnp.concatenate([b1, br], axis=0)

    # Split the ghost2 primary weight along its input channels so the kernel
    # consumes the two ghost1 halves without materialising their concat.
    w2a = w2[:, :init1]
    w2b = (w2[:, init1:mid] if cheap1 > 0
           else jnp.zeros((w2.shape[0], 1), w2.dtype))  # unused dummy

    # Boundary masks folded into the depthwise tap weights (host-side).
    # TODO(synk): at production GhostPAN sizes (C~128, 80x80) these blow up to
    # tens of MiB; there, keep per-(C,1) tap weights and fold the mask once
    # per spatial band inside the kernel instead.
    d1m = _masked_tap_weights(d1, 3, H, W)
    d2m = _masked_tap_weights(d2, 3, H, W)

    flat = [w1, b1, d1m, bd1, w2a, w2b, b2, d2m, bd2]
    if use_shortcut_conv:
        wdw, bdw, wpw, bpw = params["shortcut"]
        flat += [_masked_tap_weights(wdw, dw_k, H, W), bdw, wpw, bpw]

    kernel = _make_bottleneck_kernel(H, W, Cin, Cout, mid, dw_k,
                                     use_shortcut_conv, use_res)

    # One batch element per grid step (squeezed batch dim): pipelined input /
    # output DMAs across the batch, "parallel" axis shards across v7x's 2 TCs.
    in_specs = [pl.BlockSpec((None, Cin, HW), lambda n: (n, 0, 0))]
    in_specs += [_full_spec(p) for p in flat]

    # TODO(synk): for realistic GhostPAN shapes (C~128, 40x40..80x80) add a
    # spatial row-band grid axis with a (dw_k//2)-row halo and set
    # vmem_limit_bytes so 2x in/out blocks + ~6 f32 (C, band*W) temps stay
    # under v7x's 64 MiB VMEM.
    # TODO(synk): while N*Cin <= 128, packing several batch elements on the
    # sublane axis with block-diagonal 1x1 weights would further amortise the
    # MXU padding; skipped here in favour of the per-batch pipelined grid.
    return pl.pallas_call(
        kernel,
        out_shape=jax.ShapeDtypeStruct((N, Cout, HW), out_dtype),
        grid=(N,),
        in_specs=in_specs,
        out_specs=pl.BlockSpec((None, Cout, HW), lambda n: (n, 0, 0)),
        compiler_params=pltpu.CompilerParams(
            dimension_semantics=("parallel",)),
    )(x_ncl, *flat)


def ghost_blocks_forward(x_nchw, blocks, res_params, out_channels,
                         kernel_size=5, use_res=False):
    """GhostBlocks.forward: NCHW in, NCHW out (matching PyTorch)."""
    N, C, H, W = x_nchw.shape
    n_blocks = len(blocks)
    if use_res and n_blocks > 1:
        # TODO(synk): num_blocks > 1 with use_res=True needs reduce_conv on the
        # original input as a separate call; not needed for the default config.
        raise NotImplementedError
    out = x_nchw.reshape(N, C, H * W)      # free view: no transposes needed
    for i, p in enumerate(blocks):
        last = i == n_blocks - 1
        fuse_res = use_res and last
        # Inter-block activations travel in bf16 (halves boundary HBM traffic);
        # the final module output stays f32 to match the PyTorch forward.
        block_dtype = jnp.float32 if last else jnp.bfloat16
        out = ghost_bottleneck_pallas(out, H, W, p, out_channels, kernel_size,
                                      fuse_res, res_params,
                                      out_dtype=block_dtype)
    return out.reshape(N, out_channels, H, W)


# ----------------------------------------------------------------------------
# Parameter construction (deterministic, BN folded into conv)
# ----------------------------------------------------------------------------
def _fold_bn(key, c):
    k1, k2, k3, k4 = jax.random.split(key, 4)
    gamma = jax.random.uniform(k1, (c,), minval=0.5, maxval=1.5)
    beta = 0.1 * jax.random.normal(k2, (c,))
    mean = 0.1 * jax.random.normal(k3, (c,))
    var = jax.random.uniform(k4, (c,), minval=0.5, maxval=1.5)
    scale = gamma / jnp.sqrt(var + BN_EPS)
    bias = beta - mean * scale
    return scale.astype(jnp.float32), bias.astype(jnp.float32)


def _ghost_module_params(key, inp, oup):
    """Primary 1x1 as (Cout_half, Cin); depthwise 3x3 as (9, Cout_half, 1)."""
    init_c = math.ceil(oup / 2)
    k1, k2, k3, k4 = jax.random.split(key, 4)
    w_p = 0.1 * jax.random.normal(k1, (init_c, inp), jnp.float32)
    s, b = _fold_bn(k2, init_c)
    w_p = w_p * s[:, None]
    b_p = b[:, None]                                       # (init_c, 1)
    w_d = 0.1 * jax.random.normal(k3, (9, init_c), jnp.float32)
    s2, b2 = _fold_bn(k4, init_c)
    w_d = (w_d * s2[None, :])[:, :, None]                  # (9, init_c, 1)
    b_d = b2[:, None]
    return w_p, b_p, w_d, b_d


def _shortcut_params(key, cin, cout, k):
    k1, k2, k3, k4 = jax.random.split(key, 4)
    wdw = 0.1 * jax.random.normal(k1, (k * k, cin), jnp.float32)
    s, b = _fold_bn(k2, cin)
    wdw = (wdw * s[None, :])[:, :, None]                   # (k*k, Cin, 1)
    bdw = b[:, None]
    wpw = 0.1 * jax.random.normal(k3, (cout, cin), jnp.float32)
    s2, b2 = _fold_bn(k4, cout)
    wpw = wpw * s2[:, None]                                # (Cout, Cin)
    bpw = b2[:, None]
    return wdw, bdw, wpw, bpw


def make_ghost_blocks_params(key, in_channels, out_channels, expand=1,
                             kernel_size=5, num_blocks=1, use_res=False):
    mid = int(out_channels * expand)
    keys = jax.random.split(key, num_blocks + 1)
    blocks = []
    cin = in_channels
    for i in range(num_blocks):
        k1, k2, k3 = jax.random.split(keys[i], 3)
        p = {"mid": mid,
             "ghost1": _ghost_module_params(k1, cin, mid),
             "ghost2": _ghost_module_params(k2, mid, out_channels)}
        if cin != out_channels:
            p["shortcut"] = _shortcut_params(k3, cin, out_channels,
                                             kernel_size)
        blocks.append(p)
        cin = out_channels
    res_params = None
    if use_res:
        kr1, kr2 = jax.random.split(keys[-1], 2)
        wr = 0.1 * jax.random.normal(kr1, (out_channels, in_channels),
                                     jnp.float32)
        br = (0.1 * jax.random.normal(kr2, (out_channels,),
                                      jnp.float32))[:, None]
        res_params = (wr, br)
    return blocks, res_params


# ----------------------------------------------------------------------------
# Pure-JAX reference (for verification; same bf16-operand matmul contraction)
# ----------------------------------------------------------------------------
def _ref_leaky(x):
    return jnp.where(x >= 0, x, x * NEG_SLOPE)


def _ref_conv1x1(x, w, b):
    # x: (N, Ci, H, W); w: (Co, Ci); b: (Co, 1)
    y = jnp.einsum("oi,nihw->nohw", w.astype(MM_DTYPE), x.astype(MM_DTYPE),
                   preferred_element_type=jnp.float32)
    return y + b.reshape(1, -1, 1, 1)


def _ref_dwconv(x, wd, k):
    # x: (N, C, H, W); wd: (k*k, C, 1) with wd[di*k + dj, c, 0] = w[di, dj, c]
    C = x.shape[1]
    w_hwio = wd.reshape(k, k, C)[:, :, None, :]
    return jax.lax.conv_general_dilated(
        x, w_hwio, (1, 1), "SAME",
        dimension_numbers=("NCHW", "HWIO", "NCHW"), feature_group_count=C)


def _ref_ghost_module(x, p, oup, relu):
    w_p, b_p, w_d, b_d = p
    x1 = _ref_conv1x1(x, w_p, b_p)
    if relu:
        x1 = _ref_leaky(x1)
    x2 = _ref_dwconv(x1, w_d, 3) + b_d.reshape(1, -1, 1, 1)
    if relu:
        x2 = _ref_leaky(x2)
    return jnp.concatenate([x1, x2], axis=1)[:, :oup]


def ref_ghost_blocks(x_nchw, blocks, res_params, out_channels,
                     kernel_size=5, use_res=False):
    out = x_nchw
    for p in blocks:
        g1 = _ref_ghost_module(out, p["ghost1"], p["mid"], relu=True)
        g2 = _ref_ghost_module(g1, p["ghost2"], out_channels, relu=False)
        if "shortcut" in p:
            wdw, bdw, wpw, bpw = p["shortcut"]
            s = _ref_dwconv(out, wdw, kernel_size) + bdw.reshape(1, -1, 1, 1)
            sc = _ref_conv1x1(s, wpw, bpw)
        else:
            sc = out
        out = g2 + sc
    if use_res:
        wr, br = res_params
        out = out + _ref_leaky(_ref_conv1x1(x_nchw, wr, br))
    return out


# ----------------------------------------------------------------------------
def _run_case(name, key, N, Cin, Cout, H, W, kernel_size, use_res):
    kx, kp = jax.random.split(key)
    x = jax.random.normal(kx, (N, Cin, H, W), jnp.float32)  # PyTorch NCHW input
    blocks, res_params = make_ghost_blocks_params(
        kp, in_channels=Cin, out_channels=Cout, expand=1,
        kernel_size=kernel_size, num_blocks=1, use_res=use_res)

    out = jax.block_until_ready(
        ghost_blocks_forward(x, blocks, res_params, Cout,
                             kernel_size=kernel_size, use_res=use_res))
    ref = jax.block_until_ready(
        ref_ghost_blocks(x, blocks, res_params, Cout,
                         kernel_size=kernel_size, use_res=use_res))

    assert out.shape == (N, Cout, H, W), (name, out.shape)
    err = float(jnp.max(jnp.abs(out - ref)))
    assert err < 5e-3, (name, err)
    return err


if __name__ == "__main__":
    key = jax.random.PRNGKey(0)
    k1, k2 = jax.random.split(key)
    # Default GhostPAN config: conv shortcut (Cin != Cout), use_res=False.
    _run_case("shortcut_conv", k1, N=2, Cin=8, Cout=4, H=16, W=16,
              kernel_size=5, use_res=False)
    # Identity shortcut (Cin == Cout) with the fused use_res reduce_conv.
    _run_case("identity_res", k2, N=2, Cin=4, Cout=4, H=16, W=16,
              kernel_size=5, use_res=True)
    print("KERNEL_OK")
</pallas_src>

<mosaic_0001>
module attributes {stable_mosaic.version = 11 : i64} {
  func.func @kernel(%arg0: i32, %arg1: memref<1x8x256xf32, #tpu.memory_space<vmem>>, %arg2: memref<2x8xf32, #tpu.memory_space<vmem>>, %arg3: memref<2x1xf32, #tpu.memory_space<vmem>>, %arg4: memref<9x2x256xf32, #tpu.memory_space<vmem>>, %arg5: memref<2x1xf32, #tpu.memory_space<vmem>>, %arg6: memref<2x2xf32, #tpu.memory_space<vmem>>, %arg7: memref<2x2xf32, #tpu.memory_space<vmem>>, %arg8: memref<2x1xf32, #tpu.memory_space<vmem>>, %arg9: memref<9x2x256xf32, #tpu.memory_space<vmem>>, %arg10: memref<2x1xf32, #tpu.memory_space<vmem>>, %arg11: memref<25x8x256xf32, #tpu.memory_space<vmem>>, %arg12: memref<8x1xf32, #tpu.memory_space<vmem>>, %arg13: memref<4x8xf32, #tpu.memory_space<vmem>>, %arg14: memref<4x1xf32, #tpu.memory_space<vmem>>, %arg15: memref<1x4x256xf32, #tpu.memory_space<vmem>>) attributes {dimension_semantics = [#tpu.dimension_semantics<parallel>], iteration_bounds = array<i64: 2>, scalar_prefetch = 0 : i64, scratch_operands = 0 : i64, tpu.core_type = #tpu.core_type<tc>, window_params = [{transform_indices = @transform_0, window_bounds = array<i64: 1, 8, 256>}, {pipeline_mode = #tpu.pipeline_mode<synchronous>, transform_indices = @transform_1, window_bounds = array<i64: 2, 8>}, {pipeline_mode = #tpu.pipeline_mode<synchronous>, transform_indices = @transform_2, window_bounds = array<i64: 2, 1>}, {pipeline_mode = #tpu.pipeline_mode<synchronous>, transform_indices = @transform_3, window_bounds = array<i64: 9, 2, 256>}, {pipeline_mode = #tpu.pipeline_mode<synchronous>, transform_indices = @transform_4, window_bounds = array<i64: 2, 1>}, {pipeline_mode = #tpu.pipeline_mode<synchronous>, transform_indices = @transform_5, window_bounds = array<i64: 2, 2>}, {pipeline_mode = #tpu.pipeline_mode<synchronous>, transform_indices = @transform_6, window_bounds = array<i64: 2, 2>}, {pipeline_mode = #tpu.pipeline_mode<synchronous>, transform_indices = @transform_7, window_bounds = array<i64: 2, 1>}, {pipeline_mode = #tpu.pipeline_mode<synchronous>, transform_indices = @transform_8, window_bounds = array<i64: 9, 2, 256>}, {pipeline_mode = #tpu.pipeline_mode<synchronous>, transform_indices = @transform_9, window_bounds = array<i64: 2, 1>}, {pipeline_mode = #tpu.pipeline_mode<synchronous>, transform_indices = @transform_10, window_bounds = array<i64: 25, 8, 256>}, {pipeline_mode = #tpu.pipeline_mode<synchronous>, transform_indices = @transform_11, window_bounds = array<i64: 8, 1>}, {pipeline_mode = #tpu.pipeline_mode<synchronous>, transform_indices = @transform_12, window_bounds = array<i64: 4, 8>}, {pipeline_mode = #tpu.pipeline_mode<synchronous>, transform_indices = @transform_13, window_bounds = array<i64: 4, 1>}, {transform_indices = @transform_14, window_bounds = array<i64: 1, 4, 256>}]} {
    %c0 = arith.constant 0 : index
    %c0_0 = arith.constant 0 : index
    %c0_1 = arith.constant 0 : index
    %0 = vector.load %arg1[%c0, %c0_0, %c0_1] : memref<1x8x256xf32, #tpu.memory_space<vmem>>, vector<1x8x256xf32>
    %1 = vector.shape_cast %0 : vector<1x8x256xf32> to vector<8x256xf32>
    %2 = arith.truncf %1 : vector<8x256xf32> to vector<8x256xbf16>
    %c0_2 = arith.constant 0 : index
    %c0_3 = arith.constant 0 : index
    %3 = vector.load %arg2[%c0_2, %c0_3] : memref<2x8xf32, #tpu.memory_space<vmem>>, vector<2x8xf32>
    %4 = arith.truncf %3 : vector<2x8xf32> to vector<2x8xbf16>
    %cst = arith.constant dense<0.000000e+00> : vector<2x256xf32>
    %5 = tpu.matmul %4, %2, %cst {dimension_numbers = #tpu.dot_dimension_numbers<[1], [0], [0], [1], [0, 0, 1, 1], [], []>} : vector<2x8xbf16>, vector<8x256xbf16>, vector<2x256xf32> -> vector<2x256xf32>
    %c0_4 = arith.constant 0 : index
    %c0_5 = arith.constant 0 : index
    %6 = vector.load %arg3[%c0_4, %c0_5] : memref<2x1xf32, #tpu.memory_space<vmem>>, vector<2x1xf32>
    %7 = vector.broadcast %6 : vector<2x1xf32> to vector<2x256xf32>
    %8 = arith.addf %5, %7 : vector<2x256xf32>
    %cst_6 = arith.constant 1.000000e-01 : f32
    %9 = vector.broadcast %cst_6 : f32 to vector<2x256xf32>
    %10 = arith.mulf %8, %9 : vector<2x256xf32>
    %11 = arith.maximumf %8, %10 : vector<2x256xf32>
    %c17_i32 = arith.constant 17 : i32
    %12 = tpu.dynamic_rotate %11 by %c17_i32 dim 1 : vector<2x256xf32>, i32 -> vector<2x256xf32>
    %c0_7 = arith.constant 0 : index
    %c0_8 = arith.constant 0 : index
    %c0_9 = arith.constant 0 : index
    %13 = vector.load %arg4[%c0_7, %c0_8, %c0_9] : memref<9x2x256xf32, #tpu.memory_space<vmem>>, vector<1x2x256xf32>
    %14 = vector.shape_cast %13 : vector<1x2x256xf32> to vector<2x256xf32>
    %15 = arith.mulf %12, %14 : vector<2x256xf32>
    %c16_i32 = arith.constant 16 : i32
    %16 = tpu.dynamic_rotate %11 by %c16_i32 dim 1 : vector<2x256xf32>, i32 -> vector<2x256xf32>
    %c1 = arith.constant 1 : index
    %c0_10 = arith.constant 0 : index
    %c0_11 = arith.constant 0 : index
    %17 = vector.load %arg4[%c1, %c0_10, %c0_11] : memref<9x2x256xf32, #tpu.memory_space<vmem>>, vector<1x2x256xf32>
    %18 = vector.shape_cast %17 : vector<1x2x256xf32> to vector<2x256xf32>
    %19 = arith.mulf %16, %18 : vector<2x256xf32>
    %c15_i32 = arith.constant 15 : i32
    %20 = tpu.dynamic_rotate %11 by %c15_i32 dim 1 : vector<2x256xf32>, i32 -> vector<2x256xf32>
    %c2 = arith.constant 2 : index
    %c0_12 = arith.constant 0 : index
    %c0_13 = arith.constant 0 : index
    %21 = vector.load %arg4[%c2, %c0_12, %c0_13] : memref<9x2x256xf32, #tpu.memory_space<vmem>>, vector<1x2x256xf32>
    %22 = vector.shape_cast %21 : vector<1x2x256xf32> to vector<2x256xf32>
    %23 = arith.mulf %20, %22 : vector<2x256xf32>
    %c1_i32 = arith.constant 1 : i32
    %24 = tpu.dynamic_rotate %11 by %c1_i32 dim 1 : vector<2x256xf32>, i32 -> vector<2x256xf32>
    %c3 = arith.constant 3 : index
    %c0_14 = arith.constant 0 : index
    %c0_15 = arith.constant 0 : index
    %25 = vector.load %arg4[%c3, %c0_14, %c0_15] : memref<9x2x256xf32, #tpu.memory_space<vmem>>, vector<1x2x256xf32>
    %26 = vector.shape_cast %25 : vector<1x2x256xf32> to vector<2x256xf32>
    %27 = arith.mulf %24, %26 : vector<2x256xf32>
    %c4 = arith.constant 4 : index
    %c0_16 = arith.constant 0 : index
    %c0_17 = arith.constant 0 : index
    %28 = vector.load %arg4[%c4, %c0_16, %c0_17] : memref<9x2x256xf32, #tpu.memory_space<vmem>>, vector<1x2x256xf32>
    %29 = vector.shape_cast %28 : vector<1x2x256xf32> to vector<2x256xf32>
    %30 = arith.mulf %11, %29 : vector<2x256xf32>
    %c255_i32 = arith.constant 255 : i32
    %31 = tpu.dynamic_rotate %11 by %c255_i32 dim 1 : vector<2x256xf32>, i32 -> vector<2x256xf32>
    %c5 = arith.constant 5 : index
    %c0_18 = arith.constant 0 : index
    %c0_19 = arith.constant 0 : index
    %32 = vector.load %arg4[%c5, %c0_18, %c0_19] : memref<9x2x256xf32, #tpu.memory_space<vmem>>, vector<1x2x256xf32>
    %33 = vector.shape_cast %32 : vector<1x2x256xf32> to vector<2x256xf32>
    %34 = arith.mulf %31, %33 : vector<2x256xf32>
    %c241_i32 = arith.constant 241 : i32
    %35 = tpu.dynamic_rotate %11 by %c241_i32 dim 1 : vector<2x256xf32>, i32 -> vector<2x256xf32>
    %c6 = arith.constant 6 : index
    %c0_20 = arith.constant 0 : index
    %c0_21 = arith.constant 0 : index
    %36 = vector.load %arg4[%c6, %c0_20, %c0_21] : memref<9x2x256xf32, #tpu.memory_space<vmem>>, vector<1x2x256xf32>
    %37 = vector.shape_cast %36 : vector<1x2x256xf32> to vector<2x256xf32>
    %38 = arith.mulf %35, %37 : vector<2x256xf32>
    %c240_i32 = arith.constant 240 : i32
    %39 = tpu.dynamic_rotate %11 by %c240_i32 dim 1 : vector<2x256xf32>, i32 -> vector<2x256xf32>
    %c7 = arith.constant 7 : index
    %c0_22 = arith.constant 0 : index
    %c0_23 = arith.constant 0 : index
    %40 = vector.load %arg4[%c7, %c0_22, %c0_23] : memref<9x2x256xf32, #tpu.memory_space<vmem>>, vector<1x2x256xf32>
    %41 = vector.shape_cast %40 : vector<1x2x256xf32> to vector<2x256xf32>
    %42 = arith.mulf %39, %41 : vector<2x256xf32>
    %c239_i32 = arith.constant 239 : i32
    %43 = tpu.dynamic_rotate %11 by %c239_i32 dim 1 : vector<2x256xf32>, i32 -> vector<2x256xf32>
    %c8 = arith.constant 8 : index
    %c0_24 = arith.constant 0 : index
    %c0_25 = arith.constant 0 : index
    %44 = vector.load %arg4[%c8, %c0_24, %c0_25] : memref<9x2x256xf32, #tpu.memory_space<vmem>>, vector<1x2x256xf32>
    %45 = vector.shape_cast %44 : vector<1x2x256xf32> to vector<2x256xf32>
    %46 = arith.mulf %43, %45 : vector<2x256xf32>
    %47 = arith.addf %15, %19 : vector<2x256xf32>
    %48 = arith.addf %23, %27 : vector<2x256xf32>
    %49 = arith.addf %30, %34 : vector<2x256xf32>
    %50 = arith.addf %38, %42 : vector<2x256xf32>
    %51 = arith.addf %47, %48 : vector<2x256xf32>
    %52 = arith.addf %49, %50 : vector<2x256xf32>
    %53 = arith.addf %51, %52 : vector<2x256xf32>
    %54 = arith.addf %53, %46 : vector<2x256xf32>
    %c0_26 = arith.constant 0 : index
    %c0_27 = arith.constant 0 : index
    %55 = vector.load %arg5[%c0_26, %c0_27] : memref<2x1xf32, #tpu.memory_space<vmem>>, vector<2x1xf32>
    %56 = vector.broadcast %55 : vector<2x1xf32> to vector<2x256xf32>
    %57 = arith.addf %54, %56 : vector<2x256xf32>
    %cst_28 = arith.constant 1.000000e-01 : f32
    %58 = vector.broadcast %cst_28 : f32 to vector<2x256xf32>
    %59 = arith.mulf %57, %58 : vector<2x256xf32>
    %60 = arith.maximumf %57, %59 : vector<2x256xf32>
    %c0_29 = arith.constant 0 : index
    %c0_30 = arith.constant 0 : index
    %61 = vector.load %arg6[%c0_29, %c0_30] : memref<2x2xf32, #tpu.memory_space<vmem>>, vector<2x2xf32>
    %62 = arith.truncf %61 : vector<2x2xf32> to vector<2x2xbf16>
    %63 = arith.truncf %11 : vector<2x256xf32> to vector<2x256xbf16>
    %cst_31 = arith.constant dense<0.000000e+00> : vector<2x256xf32>
    %64 = tpu.matmul %62, %63, %cst_31 {dimension_numbers = #tpu.dot_dimension_numbers<[1], [0], [0], [1], [0, 0, 1, 1], [], []>} : vector<2x2xbf16>, vector<2x256xbf16>, vector<2x256xf32> -> vector<2x256xf32>
    %c0_32 = arith.constant 0 : index
    %c0_33 = arith.constant 0 : index
    %65 = vector.load %arg8[%c0_32, %c0_33] : memref<2x1xf32, #tpu.memory_space<vmem>>, vector<2x1xf32>
    %66 = vector.broadcast %65 : vector<2x1xf32> to vector<2x256xf32>
    %67 = arith.addf %64, %66 : vector<2x256xf32>
    %c0_34 = arith.constant 0 : index
    %c0_35 = arith.constant 0 : index
    %68 = vector.load %arg7[%c0_34, %c0_35] : memref<2x2xf32, #tpu.memory_space<vmem>>, vector<2x2xf32>
    %69 = arith.truncf %68 : vector<2x2xf32> to vector<2x2xbf16>
    %70 = arith.truncf %60 : vector<2x256xf32> to vector<2x256xbf16>
    %cst_36 = arith.constant dense<0.000000e+00> : vector<2x256xf32>
    %71 = tpu.matmul %69, %70, %cst_36 {dimension_numbers = #tpu.dot_dimension_numbers<[1], [0], [0], [1], [0, 0, 1, 1], [], []>} : vector<2x2xbf16>, vector<2x256xbf16>, vector<2x256xf32> -> vector<2x256xf32>
    %72 = arith.addf %67, %71 : vector<2x256xf32>
    %c17_i32_37 = arith.constant 17 : i32
    %73 = tpu.dynamic_rotate %72 by %c17_i32_37 dim 1 : vector<2x256xf32>, i32 -> vector<2x256xf32>
    %c0_38 = arith.constant 0 : index
    %c0_39 = arith.constant 0 : index
    %c0_40 = arith.constant 0 : index
    %74 = vector.load %arg9[%c0_38, %c0_39, %c0_40] : memref<9x2x256xf32, #tpu.memory_space<vmem>>, vector<1x2x256xf32>
    %75 = vector.shape_cast %74 : vector<1x2x256xf32> to vector<2x256xf32>
    %76 = arith.mulf %73, %75 : vector<2x256xf32>
    %c16_i32_41 = arith.constant 16 : i32
    %77 = tpu.dynamic_rotate %72 by %c16_i32_41 dim 1 : vector<2x256xf32>, i32 -> vector<2x256xf32>
    %c1_42 = arith.constant 1 : index
    %c0_43 = arith.constant 0 : index
    %c0_44 = arith.constant 0 : index
    %78 = vector.load %arg9[%c1_42, %c0_43, %c0_44] : memref<9x2x256xf32, #tpu.memory_space<vmem>>, vector<1x2x256xf32>
    %79 = vector.shape_cast %78 : vector<1x2x256xf32> to vector<2x256xf32>
    %80 = arith.mulf %77, %79 : vector<2x256xf32>
    %c15_i32_45 = arith.constant 15 : i32
    %81 = tpu.dynamic_rotate %72 by %c15_i32_45 dim 1 : vector<2x256xf32>, i32 -> vector<2x256xf32>
    %c2_46 = arith.constant 2 : index
    %c0_47 = arith.constant 0 : index
    %c0_48 = arith.constant 0 : index
    %82 = vector.load %arg9[%c2_46, %c0_47, %c0_48] : memref<9x2x256xf32, #tpu.memory_space<vmem>>, vector<1x2x256xf32>
    %83 = vector.shape_cast %82 : vector<1x2x256xf32> to vector<2x256xf32>
    %84 = arith.mulf %81, %83 : vector<2x256xf32>
    %c1_i32_49 = arith.constant 1 : i32
    %85 = tpu.dynamic_rotate %72 by %c1_i32_49 dim 1 : vector<2x256xf32>, i32 -> vector<2x256xf32>
    %c3_50 = arith.constant 3 : index
    %c0_51 = arith.constant 0 : index
    %c0_52 = arith.constant 0 : index
    %86 = vector.load %arg9[%c3_50, %c0_51, %c0_52] : memref<9x2x256xf32, #tpu.memory_space<vmem>>, vector<1x2x256xf32>
    %87 = vector.shape_cast %86 : vector<1x2x256xf32> to vector<2x256xf32>
    %88 = arith.mulf %85, %87 : vector<2x256xf32>
    %c4_53 = arith.constant 4 : index
    %c0_54 = arith.constant 0 : index
    %c0_55 = arith.constant 0 : index
    %89 = vector.load %arg9[%c4_53, %c0_54, %c0_55] : memref<9x2x256xf32, #tpu.memory_space<vmem>>, vector<1x2x256xf32>
    %90 = vector.shape_cast %89 : vector<1x2x256xf32> to vector<2x256xf32>
    %91 = arith.mulf %72, %90 : vector<2x256xf32>
    %c255_i32_56 = arith.constant 255 : i32
    %92 = tpu.dynamic_rotate %72 by %c255_i32_56 dim 1 : vector<2x256xf32>, i32 -> vector<2x256xf32>
    %c5_57 = arith.constant 5 : index
    %c0_58 = arith.constant 0 : index
    %c0_59 = arith.constant 0 : index
    %93 = vector.load %arg9[%c5_57, %c0_58, %c0_59] : memref<9x2x256xf32, #tpu.memory_space<vmem>>, vector<1x2x256xf32>
    %94 = vector.shape_cast %93 : vector<1x2x256xf32> to vector<2x256xf32>
    %95 = arith.mulf %92, %94 : vector<2x256xf32>
    %c241_i32_60 = arith.constant 241 : i32
    %96 = tpu.dynamic_rotate %72 by %c241_i32_60 dim 1 : vector<2x256xf32>, i32 -> vector<2x256xf32>
    %c6_61 = arith.constant 6 : index
    %c0_62 = arith.constant 0 : index
    %c0_63 = arith.constant 0 : index
    %97 = vector.load %arg9[%c6_61, %c0_62, %c0_63] : memref<9x2x256xf32, #tpu.memory_space<vmem>>, vector<1x2x256xf32>
    %98 = vector.shape_cast %97 : vector<1x2x256xf32> to vector<2x256xf32>
    %99 = arith.mulf %96, %98 : vector<2x256xf32>
    %c240_i32_64 = arith.constant 240 : i32
    %100 = tpu.dynamic_rotate %72 by %c240_i32_64 dim 1 : vector<2x256xf32>, i32 -> vector<2x256xf32>
    %c7_65 = arith.constant 7 : index
    %c0_66 = arith.constant 0 : index
    %c0_67 = arith.constant 0 : index
    %101 = vector.load %arg9[%c7_65, %c0_66, %c0_67] : memref<9x2x256xf32, #tpu.memory_space<vmem>>, vector<1x2x256xf32>
    %102 = vector.shape_cast %101 : vector<1x2x256xf32> to vector<2x256xf32>
    %103 = arith.mulf %100, %102 : vector<2x256xf32>
    %c239_i32_68 = arith.constant 239 : i32
    %104 = tpu.dynamic_rotate %72 by %c239_i32_68 dim 1 : vector<2x256xf32>, i32 -> vector<2x256xf32>
    %c8_69 = arith.constant 8 : index
    %c0_70 = arith.constant 0 : index
    %c0_71 = arith.constant 0 : index
    %105 = vector.load %arg9[%c8_69, %c0_70, %c0_71] : memref<9x2x256xf32, #tpu.memory_space<vmem>>, vector<1x2x256xf32>
    %106 = vector.shape_cast %105 : vector<1x2x256xf32> to vector<2x256xf32>
    %107 = arith.mulf %104, %106 : vector<2x256xf32>
    %108 = arith.addf %76, %80 : vector<2x256xf32>
    %109 = arith.addf %84, %88 : vector<2x256xf32>
    %110 = arith.addf %91, %95 : vector<2x256xf32>
    %111 = arith.addf %99, %103 : vector<2x256xf32>
    %112 = arith.addf %108, %109 : vector<2x256xf32>
    %113 = arith.addf %110, %111 : vector<2x256xf32>
    %114 = arith.addf %112, %113 : vector<2x256xf32>
    %115 = arith.addf %114, %107 : vector<2x256xf32>
    %c0_72 = arith.constant 0 : index
    %c0_73 = arith.constant 0 : index
    %116 = vector.load %arg10[%c0_72, %c0_73] : memref<2x1xf32, #tpu.memory_space<vmem>>, vector<2x1xf32>
    %117 = vector.broadcast %116 : vector<2x1xf32> to vector<2x256xf32>
    %118 = arith.addf %115, %117 : vector<2x256xf32>
    %c34_i32 = arith.constant 34 : i32
    %119 = tpu.dynamic_rotate %1 by %c34_i32 dim 1 : vector<8x256xf32>, i32 -> vector<8x256xf32>
    %c0_74 = arith.constant 0 : index
    %c0_75 = arith.constant 0 : index
    %c0_76 = arith.constant 0 : index
    %120 = vector.load %arg11[%c0_74, %c0_75, %c0_76] : memref<25x8x256xf32, #tpu.memory_space<vmem>>, vector<1x8x256xf32>
    %121 = vector.shape_cast %120 : vector<1x8x256xf32> to vector<8x256xf32>
    %122 = arith.mulf %119, %121 : vector<8x256xf32>
    %c33_i32 = arith.constant 33 : i32
    %123 = tpu.dynamic_rotate %1 by %c33_i32 dim 1 : vector<8x256xf32>, i32 -> vector<8x256xf32>
    %c1_77 = arith.constant 1 : index
    %c0_78 = arith.constant 0 : index
    %c0_79 = arith.constant 0 : index
    %124 = vector.load %arg11[%c1_77, %c0_78, %c0_79] : memref<25x8x256xf32, #tpu.memory_space<vmem>>, vector<1x8x256xf32>
    %125 = vector.shape_cast %124 : vector<1x8x256xf32> to vector<8x256xf32>
    %126 = arith.mulf %123, %125 : vector<8x256xf32>
    %c32_i32 = arith.constant 32 : i32
    %127 = tpu.dynamic_rotate %1 by %c32_i32 dim 1 : vector<8x256xf32>, i32 -> vector<8x256xf32>
    %c2_80 = arith.constant 2 : index
    %c0_81 = arith.constant 0 : index
    %c0_82 = arith.constant 0 : index
    %128 = vector.load %arg11[%c2_80, %c0_81, %c0_82] : memref<25x8x256xf32, #tpu.memory_space<vmem>>, vector<1x8x256xf32>
    %129 = vector.shape_cast %128 : vector<1x8x256xf32> to vector<8x256xf32>
    %130 = arith.mulf %127, %129 : vector<8x256xf32>
    %c31_i32 = arith.constant 31 : i32
    %131 = tpu.dynamic_rotate %1 by %c31_i32 dim 1 : vector<8x256xf32>, i32 -> vector<8x256xf32>
    %c3_83 = arith.constant 3 : index
    %c0_84 = arith.constant 0 : index
    %c0_85 = arith.constant 0 : index
    %132 = vector.load %arg11[%c3_83, %c0_84, %c0_85] : memref<25x8x256xf32, #tpu.memory_space<vmem>>, vector<1x8x256xf32>
    %133 = vector.shape_cast %132 : vector<1x8x256xf32> to vector<8x256xf32>
    %134 = arith.mulf %131, %133 : vector<8x256xf32>
    %c30_i32 = arith.constant 30 : i32
    %135 = tpu.dynamic_rotate %1 by %c30_i32 dim 1 : vector<8x256xf32>, i32 -> vector<8x256xf32>
    %c4_86 = arith.constant 4 : index
    %c0_87 = arith.constant 0 : index
    %c0_88 = arith.constant 0 : index
    %136 = vector.load %arg11[%c4_86, %c0_87, %c0_88] : memref<25x8x256xf32, #tpu.memory_space<vmem>>, vector<1x8x256xf32>
    %137 = vector.shape_cast %136 : vector<1x8x256xf32> to vector<8x256xf32>
    %138 = arith.mulf %135, %137 : vector<8x256xf32>
    %c18_i32 = arith.constant 18 : i32
    %139 = tpu.dynamic_rotate %1 by %c18_i32 dim 1 : vector<8x256xf32>, i32 -> vector<8x256xf32>
    %c5_89 = arith.constant 5 : index
    %c0_90 = arith.constant 0 : index
    %c0_91 = arith.constant 0 : index
    %140 = vector.load %arg11[%c5_89, %c0_90, %c0_91] : memref<25x8x256xf32, #tpu.memory_space<vmem>>, vector<1x8x256xf32>
    %141 = vector.shape_cast %140 : vector<1x8x256xf32> to vector<8x256xf32>
    %142 = arith.mulf %139, %141 : vector<8x256xf32>
    %c17_i32_92 = arith.constant 17 : i32
    %143 = tpu.dynamic_rotate %1 by %c17_i32_92 dim 1 : vector<8x256xf32>, i32 -> vector<8x256xf32>
    %c6_93 = arith.constant 6 : index
    %c0_94 = arith.constant 0 : index
    %c0_95 = arith.constant 0 : index
    %144 = vector.load %arg11[%c6_93, %c0_94, %c0_95] : memref<25x8x256xf32, #tpu.memory_space<vmem>>, vector<1x8x256xf32>
    %145 = vector.shape_cast %144 : vector<1x8x256xf32> to vector<8x256xf32>
    %146 = arith.mulf %143, %145 : vector<8x256xf32>
    %c16_i32_96 = arith.constant 16 : i32
    %147 = tpu.dynamic_rotate %1 by %c16_i32_96 dim 1 : vector<8x256xf32>, i32 -> vector<8x256xf32>
    %c7_97 = arith.constant 7 : index
    %c0_98 = arith.constant 0 : index
    %c0_99 = arith.constant 0 : index
    %148 = vector.load %arg11[%c7_97, %c0_98, %c0_99] : memref<25x8x256xf32, #tpu.memory_space<vmem>>, vector<1x8x256xf32>
    %149 = vector.shape_cast %148 : vector<1x8x256xf32> to vector<8x256xf32>
    %150 = arith.mulf %147, %149 : vector<8x256xf32>
    %c15_i32_100 = arith.constant 15 : i32
    %151 = tpu.dynamic_rotate %1 by %c15_i32_100 dim 1 : vector<8x256xf32>, i32 -> vector<8x256xf32>
    %c8_101 = arith.constant 8 : index
    %c0_102 = arith.constant 0 : index
    %c0_103 = arith.constant 0 : index
    %152 = vector.load %arg11[%c8_101, %c0_102, %c0_103] : memref<25x8x256xf32, #tpu.memory_space<vmem>>, vector<1x8x256xf32>
    %153 = vector.shape_cast %152 : vector<1x8x256xf32> to vector<8x256xf32>
    %154 = arith.mulf %151, %153 : vector<8x256xf32>
    %c14_i32 = arith.constant 14 : i32
    %155 = tpu.dynamic_rotate %1 by %c14_i32 dim 1 : vector<8x256xf32>, i32 -> vector<8x256xf32>
    %c9 = arith.constant 9 : index
    %c0_104 = arith.constant 0 : index
    %c0_105 = arith.constant 0 : index
    %156 = vector.load %arg11[%c9, %c0_104, %c0_105] : memref<25x8x256xf32, #tpu.memory_space<vmem>>, vector<1x8x256xf32>
    %157 = vector.shape_cast %156 : vector<1x8x256xf32> to vector<8x256xf32>
    %158 = arith.mulf %155, %157 : vector<8x256xf32>
    %c2_i32 = arith.constant 2 : i32
    %159 = tpu.dynamic_rotate %1 by %c2_i32 dim 1 : vector<8x256xf32>, i32 -> vector<8x256xf32>
    %c10 = arith.constant 10 : index
    %c0_106 = arith.constant 0 : index
    %c0_107 = arith.constant 0 : index
    %160 = vector.load %arg11[%c10, %c0_106, %c0_107] : memref<25x8x256xf32, #tpu.memory_space<vmem>>, vector<1x8x256xf32>
    %161 = vector.shape_cast %160 : vector<1x8x256xf32> to vector<8x256xf32>
    %162 = arith.mulf %159, %161 : vector<8x256xf32>
    %c1_i32_108 = arith.constant 1 : i32
    %163 = tpu.dynamic_rotate %1 by %c1_i32_108 dim 1 : vector<8x256xf32>, i32 -> vector<8x256xf32>
    %c11 = arith.constant 11 : index
    %c0_109 = arith.constant 0 : index
    %c0_110 = arith.constant 0 : index
    %164 = vector.load %arg11[%c11, %c0_109, %c0_110] : memref<25x8x256xf32, #tpu.memory_space<vmem>>, vector<1x8x256xf32>
    %165 = vector.shape_cast %164 : vector<1x8x256xf32> to vector<8x256xf32>
    %166 = arith.mulf %163, %165 : vector<8x256xf32>
    %c12 = arith.constant 12 : index
    %c0_111 = arith.constant 0 : index
    %c0_112 = arith.constant 0 : index
    %167 = vector.load %arg11[%c12, %c0_111, %c0_112] : memref<25x8x256xf32, #tpu.memory_space<vmem>>, vector<1x8x256xf32>
    %168 = vector.shape_cast %167 : vector<1x8x256xf32> to vector<8x256xf32>
    %169 = arith.mulf %1, %168 : vector<8x256xf32>
    %c255_i32_113 = arith.constant 255 : i32
    %170 = tpu.dynamic_rotate %1 by %c255_i32_113 dim 1 : vector<8x256xf32>, i32 -> vector<8x256xf32>
    %c13 = arith.constant 13 : index
    %c0_114 = arith.constant 0 : index
    %c0_115 = arith.constant 0 : index
    %171 = vector.load %arg11[%c13, %c0_114, %c0_115] : memref<25x8x256xf32, #tpu.memory_space<vmem>>, vector<1x8x256xf32>
    %172 = vector.shape_cast %171 : vector<1x8x256xf32> to vector<8x256xf32>
    %173 = arith.mulf %170, %172 : vector<8x256xf32>
    %c254_i32 = arith.constant 254 : i32
    %174 = tpu.dynamic_rotate %1 by %c254_i32 dim 1 : vector<8x256xf32>, i32 -> vector<8x256xf32>
    %c14 = arith.constant 14 : index
    %c0_116 = arith.constant 0 : index
    %c0_117 = arith.constant 0 : index
    %175 = vector.load %arg11[%c14, %c0_116, %c0_117] : memref<25x8x256xf32, #tpu.memory_space<vmem>>, vector<1x8x256xf32>
    %176 = vector.shape_cast %175 : vector<1x8x256xf32> to vector<8x256xf32>
    %177 = arith.mulf %174, %176 : vector<8x256xf32>
    %c242_i32 = arith.constant 242 : i32
    %178 = tpu.dynamic_rotate %1 by %c242_i32 dim 1 : vector<8x256xf32>, i32 -> vector<8x256xf32>
    %c15 = arith.constant 15 : index
    %c0_118 = arith.constant 0 : index
    %c0_119 = arith.constant 0 : index
    %179 = vector.load %arg11[%c15, %c0_118, %c0_119] : memref<25x8x256xf32, #tpu.memory_space<vmem>>, vector<1x8x256xf32>
    %180 = vector.shape_cast %179 : vector<1x8x256xf32> to vector<8x256xf32>
    %181 = arith.mulf %178, %180 : vector<8x256xf32>
    %c241_i32_120 = arith.constant 241 : i32
    %182 = tpu.dynamic_rotate %1 by %c241_i32_120 dim 1 : vector<8x256xf32>, i32 -> vector<8x256xf32>
    %c16 = arith.constant 16 : index
    %c0_121 = arith.constant 0 : index
    %c0_122 = arith.constant 0 : index
    %183 = vector.load %arg11[%c16, %c0_121, %c0_122] : memref<25x8x256xf32, #tpu.memory_space<vmem>>, vector<1x8x256xf32>
    %184 = vector.shape_cast %183 : vector<1x8x256xf32> to vector<8x256xf32>
    %185 = arith.mulf %182, %184 : vector<8x256xf32>
    %c240_i32_123 = arith.constant 240 : i32
    %186 = tpu.dynamic_rotate %1 by %c240_i32_123 dim 1 : vector<8x256xf32>, i32 -> vector<8x256xf32>
    %c17 = arith.constant 17 : index
    %c0_124 = arith.constant 0 : index
    %c0_125 = arith.constant 0 : index
    %187 = vector.load %arg11[%c17, %c0_124, %c0_125] : memref<25x8x256xf32, #tpu.memory_space<vmem>>, vector<1x8x256xf32>
    %188 = vector.shape_cast %187 : vector<1x8x256xf32> to vector<8x256xf32>
    %189 = arith.mulf %186, %188 : vector<8x256xf32>
    %c239_i32_126 = arith.constant 239 : i32
    %190 = tpu.dynamic_rotate %1 by %c239_i32_126 dim 1 : vector<8x256xf32>, i32 -> vector<8x256xf32>
    %c18 = arith.constant 18 : index
    %c0_127 = arith.constant 0 : index
    %c0_128 = arith.constant 0 : index
    %191 = vector.load %arg11[%c18, %c0_127, %c0_128] : memref<25x8x256xf32, #tpu.memory_space<vmem>>, vector<1x8x256xf32>
    %192 = vector.shape_cast %191 : vector<1x8x256xf32> to vector<8x256xf32>
    %193 = arith.mulf %190, %192 : vector<8x256xf32>
    %c238_i32 = arith.constant 238 : i32
    %194 = tpu.dynamic_rotate %1 by %c238_i32 dim 1 : vector<8x256xf32>, i32 -> vector<8x256xf32>
    %c19 = arith.constant 19 : index
    %c0_129 = arith.constant 0 : index
    %c0_130 = arith.constant 0 : index
    %195 = vector.load %arg11[%c19, %c0_129, %c0_130] : memref<25x8x256xf32, #tpu.memory_space<vmem>>, vector<1x8x256xf32>
    %196 = vector.shape_cast %195 : vector<1x8x256xf32> to vector<8x256xf32>
    %197 = arith.mulf %194, %196 : vector<8x256xf32>
    %c226_i32 = arith.constant 226 : i32
    %198 = tpu.dynamic_rotate %1 by %c226_i32 dim 1 : vector<8x256xf32>, i32 -> vector<8x256xf32>
    %c20 = arith.constant 20 : index
    %c0_131 = arith.constant 0 : index
    %c0_132 = arith.constant 0 : index
    %199 = vector.load %arg11[%c20, %c0_131, %c0_132] : memref<25x8x256xf32, #tpu.memory_space<vmem>>, vector<1x8x256xf32>
    %200 = vector.shape_cast %199 : vector<1x8x256xf32> to vector<8x256xf32>
    %201 = arith.mulf %198, %200 : vector<8x256xf32>
    %c225_i32 = arith.constant 225 : i32
    %202 = tpu.dynamic_rotate %1 by %c225_i32 dim 1 : vector<8x256xf32>, i32 -> vector<8x256xf32>
    %c21 = arith.constant 21 : index
    %c0_133 = arith.constant 0 : index
    %c0_134 = arith.constant 0 : index
    %203 = vector.load %arg11[%c21, %c0_133, %c0_134] : memref<25x8x256xf32, #tpu.memory_space<vmem>>, vector<1x8x256xf32>
    %204 = vector.shape_cast %203 : vector<1x8x256xf32> to vector<8x256xf32>
    %205 = arith.mulf %202, %204 : vector<8x256xf32>
    %c224_i32 = arith.constant 224 : i32
    %206 = tpu.dynamic_rotate %1 by %c224_i32 dim 1 : vector<8x256xf32>, i32 -> vector<8x256xf32>
    %c22 = arith.constant 22 : index
    %c0_135 = arith.constant 0 : index
    %c0_136 = arith.constant 0 : index
    %207 = vector.load %arg11[%c22, %c0_135, %c0_136] : memref<25x8x256xf32, #tpu.memory_space<vmem>>, vector<1x8x256xf32>
    %208 = vector.shape_cast %207 : vector<1x8x256xf32> to vector<8x256xf32>
    %209 = arith.mulf %206, %208 : vector<8x256xf32>
    %c223_i32 = arith.constant 223 : i32
    %210 = tpu.dynamic_rotate %1 by %c223_i32 dim 1 : vector<8x256xf32>, i32 -> vector<8x256xf32>
    %c23 = arith.constant 23 : index
    %c0_137 = arith.constant 0 : index
    %c0_138 = arith.constant 0 : index
    %211 = vector.load %arg11[%c23, %c0_137, %c0_138] : memref<25x8x256xf32, #tpu.memory_space<vmem>>, vector<1x8x256xf32>
    %212 = vector.shape_cast %211 : vector<1x8x256xf32> to vector<8x256xf32>
    %213 = arith.mulf %210, %212 : vector<8x256xf32>
    %c222_i32 = arith.constant 222 : i32
    %214 = tpu.dynamic_rotate %1 by %c222_i32 dim 1 : vector<8x256xf32>, i32 -> vector<8x256xf32>
    %c24 = arith.constant 24 : index
    %c0_139 = arith.constant 0 : index
    %c0_140 = arith.constant 0 : index
    %215 = vector.load %arg11[%c24, %c0_139, %c0_140] : memref<25x8x256xf32, #tpu.memory_space<vmem>>, vector<1x8x256xf32>
    %216 = vector.shape_cast %215 : vector<1x8x256xf32> to vector<8x256xf32>
    %217 = arith.mulf %214, %216 : vector<8x256xf32>
    %218 = arith.addf %122, %126 : vector<8x256xf32>
    %219 = arith.addf %130, %134 : vector<8x256xf32>
    %220 = arith.addf %138, %142 : vector<8x256xf32>
    %221 = arith.addf %146, %150 : vector<8x256xf32>
    %222 = arith.addf %154, %158 : vector<8x256xf32>
    %223 = arith.addf %162, %166 : vector<8x256xf32>
    %224 = arith.addf %169, %173 : vector<8x256xf32>
    %225 = arith.addf %177, %181 : vector<8x256xf32>
    %226 = arith.addf %185, %189 : vector<8x256xf32>
    %227 = arith.addf %193, %197 : vector<8x256xf32>
    %228 = arith.addf %201, %205 : vector<8x256xf32>
    %229 = arith.addf %209, %213 : vector<8x256xf32>
    %230 = arith.addf %218, %219 : vector<8x256xf32>
    %231 = arith.addf %220, %221 : vector<8x256xf32>
    %232 = arith.addf %222, %223 : vector<8x256xf32>
    %233 = arith.addf %224, %225 : vector<8x256xf32>
    %234 = arith.addf %226, %227 : vector<8x256xf32>
    %235 = arith.addf %228, %229 : vector<8x256xf32>
    %236 = arith.addf %230, %231 : vector<8x256xf32>
    %237 = arith.addf %232, %233 : vector<8x256xf32>
    %238 = arith.addf %234, %235 : vector<8x256xf32>
    %239 = arith.addf %236, %237 : vector<8x256xf32>
    %240 = arith.addf %238, %217 : vector<8x256xf32>
    %241 = arith.addf %239, %240 : vector<8x256xf32>
    %c0_141 = arith.constant 0 : index
    %c0_142 = arith.constant 0 : index
    %242 = vector.load %arg12[%c0_141, %c0_142] : memref<8x1xf32, #tpu.memory_space<vmem>>, vector<8x1xf32>
    %243 = vector.broadcast %242 : vector<8x1xf32> to vector<8x256xf32>
    %244 = arith.addf %241, %243 : vector<8x256xf32>
    %c0_143 = arith.constant 0 : index
    %c0_144 = arith.constant 0 : index
    %245 = vector.load %arg13[%c0_143, %c0_144] : memref<4x8xf32, #tpu.memory_space<vmem>>, vector<4x8xf32>
    %246 = arith.truncf %245 : vector<4x8xf32> to vector<4x8xbf16>
    %247 = arith.truncf %244 : vector<8x256xf32> to vector<8x256xbf16>
    %cst_145 = arith.constant dense<0.000000e+00> : vector<4x256xf32>
    %248 = tpu.matmul %246, %247, %cst_145 {dimension_numbers = #tpu.dot_dimension_numbers<[1], [0], [0], [1], [0, 0, 1, 1], [], []>} : vector<4x8xbf16>, vector<8x256xbf16>, vector<4x256xf32> -> vector<4x256xf32>
    %c0_146 = arith.constant 0 : index
    %c0_147 = arith.constant 0 : index
    %249 = vector.load %arg14[%c0_146, %c0_147] : memref<4x1xf32, #tpu.memory_space<vmem>>, vector<4x1xf32>
    %250 = vector.broadcast %249 : vector<4x1xf32> to vector<4x256xf32>
    %251 = arith.addf %248, %250 : vector<4x256xf32>
    %252 = vector.extract_strided_slice %251 {offsets = [0, 0], sizes = [2, 256], strides = [1, 1]} : vector<4x256xf32> to vector<2x256xf32>
    %253 = arith.addf %72, %252 : vector<2x256xf32>
    %c0_148 = arith.constant 0 : index
    %c0_149 = arith.constant 0 : index
    %c0_150 = arith.constant 0 : index
    %254 = vector.load %arg15[%c0_148, %c0_149, %c0_150] : memref<1x4x256xf32, #tpu.memory_space<vmem>>, vector<1x2x256xf32>
    %255 = vector.shape_cast %254 : vector<1x2x256xf32> to vector<2x256xf32>
    %256 = vector.shape_cast %253 : vector<2x256xf32> to vector<1x2x256xf32>
    tpu.vector_store %arg15[%c0_148, %c0_149, %c0_150], %256 {strides = array<i32>} : memref<1x4x256xf32, #tpu.memory_space<vmem>>, vector<1x2x256xf32>,
    %257 = vector.extract_strided_slice %251 {offsets = [2, 0], sizes = [2, 256], strides = [1, 1]} : vector<4x256xf32> to vector<2x256xf32>
    %258 = arith.addf %118, %257 : vector<2x256xf32>
    %c0_151 = arith.constant 0 : index
    %c2_152 = arith.constant 2 : index
    %c0_153 = arith.constant 0 : index
    %259 = vector.load %arg15[%c0_151, %c2_152, %c0_153] : memref<1x4x256xf32, #tpu.memory_space<vmem>>, vector<1x2x256xf32>
    %260 = vector.shape_cast %259 : vector<1x2x256xf32> to vector<2x256xf32>
    %261 = vector.shape_cast %258 : vector<2x256xf32> to vector<1x2x256xf32>
    tpu.vector_store %arg15[%c0_151, %c2_152, %c0_153], %261 {strides = array<i32>} : memref<1x4x256xf32, #tpu.memory_space<vmem>>, vector<1x2x256xf32>,
    return
  }
  func.func @transform_0(%arg0: i32) -> (i32, i32, i32) {
    %c0_i32 = arith.constant 0 : i32
    %c0_i32_0 = arith.constant 0 : i32
    %c0_i32_1 = arith.constant 0 : i32
    return %arg0, %c0_i32, %c0_i32_0 : i32, i32, i32
  }
  func.func @transform_1(%arg0: i32) -> (i32, i32) {
    %c0_i32 = arith.constant 0 : i32
    %c0_i32_0 = arith.constant 0 : i32
    %c0_i32_1 = arith.constant 0 : i32
    return %c0_i32, %c0_i32_0 : i32, i32
  }
  func.func @transform_2(%arg0: i32) -> (i32, i32) {
    %c0_i32 = arith.constant 0 : i32
    %c0_i32_0 = arith.constant 0 : i32
    %c0_i32_1 = arith.constant 0 : i32
    return %c0_i32, %c0_i32_0 : i32, i32
  }
  func.func @transform_3(%arg0: i32) -> (i32, i32, i32) {
    %c0_i32 = arith.constant 0 : i32
    %c0_i32_0 = arith.constant 0 : i32
    %c0_i32_1 = arith.constant 0 : i32
    %c0_i32_2 = arith.constant 0 : i32
    return %c0_i32, %c0_i32_0, %c0_i32_1 : i32, i32, i32
  }
  func.func @transform_4(%arg0: i32) -> (i32, i32) {
    %c0_i32 = arith.constant 0 : i32
    %c0_i32_0 = arith.constant 0 : i32
    %c0_i32_1 = arith.constant 0 : i32
    return %c0_i32, %c0_i32_0 : i32, i32
  }
  func.func @transform_5(%arg0: i32) -> (i32, i32) {
    %c0_i32 = arith.constant 0 : i32
    %c0_i32_0 = arith.constant 0 : i32
    %c0_i32_1 = arith.constant 0 : i32
    return %c0_i32, %c0_i32_0 : i32, i32
  }
  func.func @transform_6(%arg0: i32) -> (i32, i32) {
    %c0_i32 = arith.constant 0 : i32
    %c0_i32_0 = arith.constant 0 : i32
    %c0_i32_1 = arith.constant 0 : i32
    return %c0_i32, %c0_i32_0 : i32, i32
  }
  func.func @transform_7(%arg0: i32) -> (i32, i32) {
    %c0_i32 = arith.constant 0 : i32
    %c0_i32_0 = arith.constant 0 : i32
    %c0_i32_1 = arith.constant 0 : i32
    return %c0_i32, %c0_i32_0 : i32, i32
  }
  func.func @transform_8(%arg0: i32) -> (i32, i32, i32) {
    %c0_i32 = arith.constant 0 : i32
    %c0_i32_0 = arith.constant 0 : i32
    %c0_i32_1 = arith.constant 0 : i32
    %c0_i32_2 = arith.constant 0 : i32
    return %c0_i32, %c0_i32_0, %c0_i32_1 : i32, i32, i32
  }
  func.func @transform_9(%arg0: i32) -> (i32, i32) {
    %c0_i32 = arith.constant 0 : i32
    %c0_i32_0 = arith.constant 0 : i32
    %c0_i32_1 = arith.constant 0 : i32
    return %c0_i32, %c0_i32_0 : i32, i32
  }
  func.func @transform_10(%arg0: i32) -> (i32, i32, i32) {
    %c0_i32 = arith.constant 0 : i32
    %c0_i32_0 = arith.constant 0 : i32
    %c0_i32_1 = arith.constant 0 : i32
    %c0_i32_2 = arith.constant 0 : i32
    return %c0_i32, %c0_i32_0, %c0_i32_1 : i32, i32, i32
  }
  func.func @transform_11(%arg0: i32) -> (i32, i32) {
    %c0_i32 = arith.constant 0 : i32
    %c0_i32_0 = arith.constant 0 : i32
    %c0_i32_1 = arith.constant 0 : i32
    return %c0_i32, %c0_i32_0 : i32, i32
  }
  func.func @transform_12(%arg0: i32) -> (i32, i32) {
    %c0_i32 = arith.constant 0 : i32
    %c0_i32_0 = arith.constant 0 : i32
    %c0_i32_1 = arith.constant 0 : i32
    return %c0_i32, %c0_i32_0 : i32, i32
  }
  func.func @transform_13(%arg0: i32) -> (i32, i32) {
    %c0_i32 = arith.constant 0 : i32
    %c0_i32_0 = arith.constant 0 : i32
    %c0_i32_1 = arith.constant 0 : i32
    return %c0_i32, %c0_i32_0 : i32, i32
  }
  func.func @transform_14(%arg0: i32) -> (i32, i32, i32) {
    %c0_i32 = arith.constant 0 : i32
    %c0_i32_0 = arith.constant 0 : i32
    %c0_i32_1 = arith.constant 0 : i32
    return %arg0, %c0_i32, %c0_i32_0 : i32, i32, i32
  }
}

</mosaic_0001>

<bundles_post_ra>
// kernel: tpu_custom_call.1
= control target key start
LH: loop header
LB: loop body
LE: loop exit
PB: predicated region body
PF: predicated region fallthrough
CT: control target
= control target key end

     0   :  { %s2621_s0 = inlined_call_operand.hbm [shape: f32[2,8,256], index: 0, kind: input, shape index: {}]   ;;  %s2622_s1 = inlined_call_operand.vmem [shape: f32[2,8], index: 1, kind: input, shape index: {}]   ;;  %s2623_s2 = inlined_call_operand.vmem [shape: f32[2,1], index: 2, kind: input, shape index: {}]   ;;  %s2624_s3 = inlined_call_operand.hbm [shape: f32[9,2,256], index: 3, kind: input, shape index: {}]   ;;  %s2625_s4 = inlined_call_operand.vmem [shape: f32[2,1], index: 4, kind: input, shape index: {}]   ;;  %s2626_s5 = inlined_call_operand.vmem [shape: f32[2,2], index: 5, kind: input, shape index: {}]   ;;  %s2627_s6 = inlined_call_operand.vmem [shape: f32[2,2], index: 6, kind: input, shape index: {}]   ;;  %s2628_s7 = inlined_call_operand.vmem [shape: f32[2,1], index: 7, kind: input, shape index: {}]   ;;  %s2629_s8 = inlined_call_operand.hbm [shape: f32[9,2,256], index: 8, kind: input, shape index: {}]   ;;  %s2630_s9 = inlined_call_operand.vmem [shape: f32[2,1], index: 9, kind: input, shape index: {}]   ;;  %s2631_s10 = inlined_call_operand.hbm [shape: f32[25,8,256], index: 10, kind: input, shape index: {}]   ;;  %s2632_s11 = inlined_call_operand.vmem [shape: f32[8,1], index: 11, kind: input, shape index: {}]   ;;  %s2633_s12 = inlined_call_operand.vmem [shape: f32[4,8], index: 12, kind: input, shape index: {}]   ;;  %s2634_s13 = inlined_call_operand.vmem [shape: f32[4,1], index: 13, kind: input, shape index: {}]   ;;  %s2635_s14 = inlined_call_operand.hbm [shape: f32[2,4,256], index: 14, kind: output, shape index: {}]  }
   0x1   :  { %2643 = sst [smem:[#allocation23_spill]] %s2624_s3 }
   0x2   :  { %2644 = sst [smem:[#allocation24_spill]] %s2629_s8 }
   0x3   :  { %2645 = sst [smem:[#allocation25_spill]] %s2631_s10 }
   0x4   :  { %2646 = sst [smem:[#allocation26_spill]] %s2635_s14 }
   0x5   :  { %19 = vsyncpa [#allocation3], 0 }
   0x6   :  { %21 = vsyncpa [#allocation3 + $0x1], 0 }
   0x7   :  { %22 = vsyncpa [#allocation6], 0 }
   0x8   :  { %23 = vsyncpa [#allocation9], 0 }
   0x9   :  { %24 = vsyncpa [#allocation4], 0 }
   0xa   :  { %26 = vsyncpa [#allocation4 + $0x1], 0  ;;  %s1980_s29 = smov 0   ;;  %s1982_s30 = smov 0  }
   0xb   :  { %s1984_s15 = smov 0   ;;  %s1986_s16 = smov 0  }
   0xc LB: > { %2647 = sst [smem:[#allocation15_spill]] %s1867_s15  ;;  %s2004_s20 = sadd.s32 4294967295, %s1871_s16   ;;  %s1871_s16 = sphi %s1986_s16, %s2671_s16   ;;  %s1867_s15 = sphi %s1984_s15, %s2673_s15   ;;  %s1863_s30 = sphi %s1982_s30, %s2675_s30   ;;  %s1859_s29 = sphi %s1980_s29, %s2674_s29  }
   0xd   : > { %s2648_s3 = sld [smem:[#allocation23_spill]]  ;;  %p1539_p0 = scmp.ge.s32.totalorder %s1871_s16, 1 }
   0xe   : > { %p53_p1 = scmp.eq.s32.totalorder %s2004_s20, 0  ;;  %p362_p2 = scmp.lt.s32.totalorder %s1871_s16, 3 }
   0xf   : > { %s1873_s22 = smov [#allocation5]   ;;  %s2650_s8 = sld [smem:[#allocation24_spill]] }
  0x10   : > { %p2009_p3 = pnand %p1539_p0, %p362_p2  ;;  %s381_s23 = sshll.u32 %s1873_s22, 4  ;;  %s382_s23 = int_to_ptr.vmem [resolvable:$true] %s381_s23 }
  0x11   : > { %s2652_s10 = sld [smem:[#allocation25_spill]]  ;;  %s1874_s22 = smov [#allocation7]  }
  0x12   : > { %p1584_p4 = pneg %p2009_p3  ;;  %s1875_s24 = smov 64  }
  0x13   : > { %s379_s19 = sshll.u32 %s2648_s3, 4  ;;  %s407_s3 = sshll.u32 %s1874_s22, 4  ;;  %s380_s19 = int_to_ptr.hbm [resolvable:$true] %s379_s19  ;;  %s408_s3 = int_to_ptr.vmem [resolvable:$true] %s407_s3 }
  0x14   : > { %p2021_p6 = pnand %p1584_p4, %p53_p1  ;;  %s1876_s25 = smov 4  }
  0x15   : > { %s405_s26 = sshll.u32 %s2650_s8, 4  ;;  %s1877_s28 = smov [#allocation8]   ;;  %s406_s26 = int_to_ptr.hbm [resolvable:$true] %s405_s26 }
  0x16   : > { %1587 = dma.hbm_to_vmem [thread:$0]  (!%p2021_p6), %s380_s19, 576, %s382_s23, [#allocation6], %s1875_s24, %s1875_s24, %s1876_s25  }
  0x17   : > { %s422_s18 = sshll.u32 %s2652_s10, 4  ;;  %s424_s17 = sshll.u32 %s1877_s28, 4  ;;  %s423_s18 = int_to_ptr.hbm [resolvable:$true] %s422_s18  ;;  %s425_s17 = int_to_ptr.vmem [resolvable:$true] %s424_s17 }
  0x18   : > { %1590 = dma.hbm_to_vmem [thread:$0]  (!%p2021_p6), %s406_s26, 576, %s408_s3, [#allocation6], %s1875_s24, %s1875_s24, %s1876_s25  }
  0x19   : > { %s1878_s22 = smov 256   ;;  %s1879_s8 = smov 16  }
  0x1a   : > { %1593 = dma.hbm_to_vmem [thread:$0]  (!%p2021_p6), %s423_s18, 6400, %s425_s17, [#allocation9], %s1878_s22, %s1878_s22, %s1879_s8  }
  0x1b   : > { %s1538_s10 = sadd.s32 4294967294, %s1871_s16   ;;  %s2036_s19 = sadd.s32 1, %s1871_s16  }
  0x1c   : > { %2653 = sst [smem:[#allocation16_spill]] %s2036_s19  ;;  %s39_s23 = sadd.s32 1, %s1867_s15 }
  0x1d   : > { %s36_s14 = ssub.s32 %s1871_s16, %s2036_s19  ;;  %p46_p7 = scmp.ne.s32.totalorder %s1867_s15, %s1863_s30 }
  0x1e   : > { %p37_p8 = scmp.eq.s32.totalorder %s36_s14, 0  ;;  %p47_p9 = scmp.eq.s32.totalorder %s1871_s16, 0 }
  0x1f   : > { %p52_p10 = scmp.ne.s32.totalorder %s1863_s30, %s1859_s29  ;;  %p349_p11 = scmp.eq.s32.totalorder %s2004_s20, 1 }
  0x20   : > { %s2048_s3 = scalar_select %p37_p8, %s1867_s15, %s39_s23  }
  0x21   : > { %p2052_p12 = por %p53_p1, %p52_p10  ;;  %p2056_p13 = por %p349_p11, %p46_p7 }
  0x22   : > { %2654 = sst [smem:[#allocation17_spill]] %s2048_s3  ;;  %p355_p0 = scmp.eq.s32.totalorder %s1538_s10, 1 }
  0x23   : > { %p48_p2 = por %p47_p9, %p46_p7  ;;  %s447_s27 = sand.u32 1, %s1867_s15  }
  0x24   : > { %p2061_p4 = por %p355_p0, %p52_p10  ;;  %p1605_p6 = scmp.lt.s32.totalorder %s1871_s16, 2 }
  0x25   : > { %s1544_s14 = sshll.u32 %s447_s27, 4  ;;  %s1566_s24 = sshll.u32 %s1871_s16, 4 }
  0x26   : > { %s2657_s18 = scalar_select %p2061_p4, 1, 0 }
  0x27   : > { %s456_s17 = scalar_lea.hbm %s2621_s0, %s1566_s24  ;;  %s451_s23 = scalar_lea.vmem [#allocation2], %s1544_s14 }
  0x28   : > { %2658 = sst [smem:[#allocation18_spill]] %s2657_s18  ;;  %s458_s22 = sshll.u32 %s456_s17, 4  ;;  %s459_s22 = int_to_ptr.hbm [resolvable:$true] %s458_s22 }
  0x29   : > { %s460_s3 = sshll.u32 %s451_s23, 4  ;;  %p2070_p8 = pnand %p1605_p6, %p48_p2  ;;  %s461_s3 = int_to_ptr.vmem [resolvable:$true] %s460_s3 }
  0x2a   : > { %s448_s15 = scalar_lea.sflag [#allocation3], %s447_s27  ;;  %s1767_s19 = sshra.s32 %s459_s22, 4  ;;  %s1768_s19 = int_to_ptr.hbm [resolvable:$true] %s1767_s19 }
  0x2b   : > { %s1769_s18 = scalar_lea.hbm %s1768_s19, 16  ;;  %p1771_p9 = pneg %p2070_p8 }
  0x2c   : > { %p1770_p7 = scmp.ne.s32.totalorder %s1768_s19, %s1769_s18  ;;  %s1774_s14 = scalar_lea.hbm %s2621_s0, 32 }
  0x2d   : > { %p1775_p0 = scmp.lt.s32.totalorder %s1768_s19, %s2621_s0  ;;  %p1776_p2 = scmp.lt.s32.totalorder %s1774_s14, %s1769_s18 }
  0x2e   : > { %p1772_p10 = pnand %p1771_p9, %p1770_p7 }
  0x2f   : > { %p1777_p6 = por %p1776_p2, %p1775_p0 }
  0x30   : > { %p1773_p11 = pneg %p1772_p10 }
  0x32   : > { %p1778_p5 = pnand %p1777_p6, %p1773_p11 }
  0x34   : > { %1781 = shalt.err (!%p1778_p5)
}
  0x35   : > { %1597 = dma.hbm_to_vmem [thread:$0]  (!%p2070_p8), %s459_s22, 256, %s461_s3, %s448_s15  }
  0x36   : > { %469 = sbr.rel (%p2009_p3) target bundleno = 683 (0x2ab), region = 76 }
  0x3b   : > { %s2087_s27 = sand.u32 1, %s1863_s30  }
  0x3c   : > { %s1548_s23 = sshll.u32 %s2087_s27, 4  ;;  %s472_s24 = scalar_lea.sflag [#allocation3], %s2087_s27 }
  0x3d   : > { %s475_s25 = scalar_lea.vmem [#allocation2], %s1548_s23 }
  0x3e   : > { %1842 = dma.done.wait (%p2052_p12), %s472_s24, 256  }
  0x3f   : > { %1844 = vsyncadd (%p2052_p12), %s472_s24, 4294967040 }
  0x40   : > { %1846 = dma.done.wait (%p53_p1), [#allocation6], 1152  }
  0x41   : > { %1848 = vsyncadd (%p53_p1), [#allocation6], 4294966144 }
  0x42   : > { %1850 = dma.done.wait (%p53_p1), [#allocation9], 6400  }
  0x43   : > { %1852 = vsyncadd (%p53_p1), [#allocation9], 4294960896  ;;  %v1880_v0 = vmov 0   ;;  %v543_v1 = vld [vmem:[%s2623_s2] sm:$0x3]  ;;  %v2106_v2 = vld [vmem:[%s475_s25] sm:$0xff]  ;;  %v594_v27 = vlaneseq }
  0x44   : > { %1674 = vset.pattern.permute.xlu0 %v1880_v0  ;;  %1675 = vset.pattern.permute.xlu2 %v1880_v0  ;;  %vm553_vm0 = vcmask 1043456   ;;  %v2108_v3 = vld [vmem:[%s475_s25 + $0x8] sm:$0xff]  ;;  %v539_v4 = vpack.c.bf16 %v2106_v2, %v2106_v2  ;;  %s1881_s26 = smov 34   ;;  %vm549_vm1 = vcmask 64512   ;;  %s1882_s28 = smov 32   ;;  %v1022_v49 = vld [vmem:[#allocation8 + $0x8] sm:$0xff] }
  0x45   : > { %1676 = vset.pattern.permute.xlu1 %v1880_v0  ;;  %546 = vperm.xlu0 %1674, %v543_v1   ;;  %v540_v5 = vpack.c.bf16 %v2108_v3, %v2108_v3  ;;  %v541_v6 = vld [vmem:[%s2622_s1] sm:$0x3]  ;;  %s1883_s17 = smov 33   ;;  %s1884_s23 = smov 31   ;;  %v599_v12 = vld [vmem:[#allocation5] sm:$0xf] }
  0x46   : > { %1016 = vrot.lane.b32.xlu1 %v2108_v3, %s1881_s26  ;;  %v753_v7 = vld [vmem:[%s2625_s4] sm:$0x3]  ;;  %v555_v8 = vsel %vm553_vm0, %v539_v4, 0  ;;  %v542_v10 = vpack.c.bf16 %v541_v6, %v541_v6  ;;  %s1885_s24 = smov 18   ;;  %s1886_s25 = smov 30   ;;  %v2185_v30 = vand.u32 127, %v594_v27 }
  0x47   : > { %756 = vperm.xlu2 %1675, %v753_v7   ;;  %v558_v9 = vsel %vm553_vm0, %v540_v5, 0  ;;  %567 = vmatpush.bf16.msra.mxu0 %v555_v8  ;;  %v769_v11 = vld [vmem:[%s2628_s7] sm:$0x3]  ;;  %s1887_s15 = smov 17   ;;  %s1888_s21 = smov 15   ;;  %v1021_v45 = vld [vmem:[#allocation8] sm:$0xff] }
  0x48   : > { %580 = vmatpush.bf16.msra.mxu1 %v558_v9  ;;  %s1889_s19 = smov 16   ;;  %s1890_s3 = smov 14   ;;  %601 = vst [vmem:[#allocation1] ss:$4 sm:$0xff] %v599_v12  ;;  %v616_v14 = vld [vmem:[#allocation5 + $0x4] sm:$0xf] }
  0x49   : > { %s1892_s18 = smov 2   ;;  %s1893_s22 = smov 127   ;;  %v633_v16 = vld [vmem:[#allocation5 + $0x8] sm:$0xf]  ;;  %v650_v19 = vld [vmem:[#allocation5 + $0xc] sm:$0xf] }
  0x4a   : > { %1553 = vmatmul.msk.bf16.vlgmr.msra.gmra.mxu0 %vm549_vm1, %v542_v10  ;;  %s1894_s10 = smov 114   ;;  %s1895_s14 = smov 126   ;;  %v660_v22 = vld [vmem:[#allocation5 + $0x10] sm:$0xf]  ;;  %vm1041_vm2 = vcmp.lt.s32.totalorder %v2185_v30, 32  ;;  %vm1018_vm3 = vcmp.lt.s32.totalorder %v2185_v30, 34 }
  0x4b   : > { %1554 = vmatmul.msk.bf16.vlgmr.msra.gmra.mxu1 %vm549_vm1, %v542_v10  ;;  %v765_v48 = vld [vmem:[%s2626_s5] sm:$0x3]  ;;  %vm1029_vm4 = vcmp.lt.s32.totalorder %v2185_v30, 33  ;;  %vm1077_vm5 = vcmp.lt.s32.totalorder %v2185_v30, 18  ;;  %v1034_v54 = vld [vmem:[#allocation8 + $0x18] sm:$0xff]  ;;  %vm779_vm6 = vcmask 1040384  }
  0x4c   : > { %v1033_v53 = vld [vmem:[#allocation8 + $0x10] sm:$0xff]  ;;  %v766_v55 = vpack.c.bf16 %v765_v48, %v765_v48  ;;  %vm775_vm7 = vcmask 15360   ;;  %v1045_v12 = vld [vmem:[#allocation8 + $0x20] sm:$0xff]  ;;  %vm1053_vm8 = vcmp.lt.s32.totalorder %v2185_v30, 31  ;;  %vm1065_vm9 = vcmp.lt.s32.totalorder %v2185_v30, 30 }
  0x4d   : > { %772 = vperm.xlu0 %1674, %v769_v11   ;;  %vm596_vm10 = vcmp.lt.s32.totalorder %v2185_v30, 17  ;;  %vm629_vm11 = vcmp.lt.s32.totalorder %v2185_v30, 15  ;;  %vm612_vm12 = vcmp.lt.s32.totalorder %v2185_v30, 16  ;;  %vm1122_vm13 = vcmp.lt.s32.totalorder %v2185_v30, 14 }
  0x4e   : > { %1037 = vrot.lane.b32.xlu1 %v2106_v2, %s1882_s28  ;;  %vm646_vm14 = vcmp.lt.s32.totalorder %v2185_v30, 1  ;;  %vm1134_vm15 = vcmp.lt.s32.totalorder %v2185_v30, 2 }
  0x4f   : > { %1025 = vrot.lane.b32.xlu2 %v2106_v2, %s1883_s17  ;;  %v2164_v13 = vld.sshfl [vmem:[#allocation1] sm:$0xff pattern:$0x73625140]  ;;  %v2166_v15 = vld.sshfl [vmem:[#allocation1 + $0x8] sm:$0xff pattern:$0x73625140] }
  0x50   : > { %2660 = vst [vmem:[#allocation19_spill] sm:$0xff] %v2164_v13 }
  0x51   : > { %2661 = vst [vmem:[#allocation20_spill] sm:$0xff] %v2166_v15 }
  0x52   : > { %618 = vst [vmem:[#allocation1] ss:$4 sm:$0xff] %v616_v14  ;;  %v1046_v14 = vld [vmem:[#allocation8 + $0x28] sm:$0xff] }
  0x55   : > { %1014 = vrot.lane.b32.xlu0 %v2106_v2, %s1881_s26  ;;  %s1891_s26 = smov 1  }
  0x56   : > { %1051 = vrot.lane.b32.xlu1 %v2108_v3, %s1884_s23 }
  0x57   : > { %1039 = vrot.lane.b32.xlu2 %v2108_v3, %s1882_s28  ;;  %s1903_s28 = smov 95  }
  0x59   : > { %v2170_v17 = vld.sshfl [vmem:[#allocation1] sm:$0xff pattern:$0x73625140]  ;;  %v2172_v18 = vld.sshfl [vmem:[#allocation1 + $0x8] sm:$0xff pattern:$0x73625140] }
  0x5a   : > { %635 = vst [vmem:[#allocation1] ss:$4 sm:$0xff] %v633_v16  ;;  %v1057_v16 = vld [vmem:[#allocation8 + $0x30] sm:$0xff] }
  0x5d   : > { %1027 = vrot.lane.b32.xlu0 %v2108_v3, %s1883_s17 }
  0x5e   : > { %1073 = vrot.lane.b32.xlu1 %v2106_v2, %s1885_s24 }
  0x5f   : > { %1061 = vrot.lane.b32.xlu2 %v2106_v2, %s1886_s25 }
  0x61   : > { %v2175_v20 = vld.sshfl [vmem:[#allocation1] sm:$0xff pattern:$0x73625140]  ;;  %v2177_v21 = vld.sshfl [vmem:[#allocation1 + $0x8] sm:$0xff pattern:$0x73625140] }
  0x62   : > { %652 = vst [vmem:[#allocation1] ss:$4 sm:$0xff] %v650_v19  ;;  %v1058_v19 = vld [vmem:[#allocation8 + $0x38] sm:$0xff] }
  0x65   : > { %1049 = vrot.lane.b32.xlu0 %v2106_v2, %s1884_s23  ;;  %s1896_s23 = smov 113  }
  0x66   : > { %1087 = vrot.lane.b32.xlu1 %v2108_v3, %s1887_s15 }
  0x67   : > { %1075 = vrot.lane.b32.xlu2 %v2108_v3, %s1885_s24  ;;  %s1897_s24 = smov 112  }
  0x69   : > { %v2181_v24 = vld.sshfl [vmem:[#allocation1] sm:$0xff pattern:$0x73625140]  ;;  %v2183_v25 = vld.sshfl [vmem:[#allocation1 + $0x8] sm:$0xff pattern:$0x73625140] }
  0x6a   : > { %662 = vst [vmem:[#allocation1] ss:$4 sm:$0xff] %v660_v22 }
  0x6d   : > { %1063 = vrot.lane.b32.xlu0 %v2108_v3, %s1886_s25  ;;  %s1898_s25 = smov 111  }
  0x6e   : > { %1107 = vrot.lane.b32.xlu1 %v2106_v2, %s1888_s21 }
  0x6f   : > { %1096 = vrot.lane.b32.xlu2 %v2106_v2, %s1889_s19 }
  0x75   : > { %1085 = vrot.lane.b32.xlu0 %v2106_v2, %s1887_s15 }
  0x76   : > { %1120 = vrot.lane.b32.xlu1 %v2108_v3, %s1890_s3 }
  0x77   : > { %1109 = vrot.lane.b32.xlu2 %v2108_v3, %s1888_s21 }
  0x7d   : > { %1098 = vrot.lane.b32.xlu0 %v2108_v3, %s1889_s19 }
  0x7e   : > { %1142 = vrot.lane.b32.xlu1 %v2106_v2, %s1891_s26 }
  0x7f   : > { %1130 = vrot.lane.b32.xlu2 %v2106_v2, %s1892_s18 }
  0x85   : > { %1118 = vrot.lane.b32.xlu0 %v2106_v2, %s1890_s3  ;;  %s1899_s3 = smov 110  }
  0x86   : > { %1160 = vrot.lane.b32.xlu1 %v2108_v3, %s1893_s22 }
  0x87   : > { %1144 = vrot.lane.b32.xlu2 %v2108_v3, %s1891_s26 }
  0x8d   : > { %1132 = vrot.lane.b32.xlu0 %v2108_v3, %s1892_s18  ;;  %s1900_s18 = smov 98  }
  0x8e   : > { %1181 = vrot.lane.b32.xlu1 %v2106_v2, %s1894_s10 }
  0x8f   : > { %1169 = vrot.lane.b32.xlu2 %v2106_v2, %s1895_s14 }
  0x95   : > { %1158 = vrot.lane.b32.xlu0 %v2106_v2, %s1893_s22 }
  0x9d   : > { %1171 = vrot.lane.b32.xlu0 %v2108_v3, %s1895_s14  ;;  %s1902_s14 = smov 96  }
  0xa1   : > { %v2179_v23 = vpop.permute.xlu2 %756 }
  0xa2   : > { %2662 = vst [vmem:[#allocation21_spill] sm:$0xff] %v2179_v23 }
  0xa9   : > { %v1026_v26 = vpop.permute.xlu2 %1025 }
  0xb1   : > { %v1040_v31 = vpop.permute.xlu2 %1039 }
  0xb7   : > { %v547_v28 = vpop.permute.xlu0 %546 }
  0xb8   : > { %v1017_v29 = vpop.permute.xlu1 %1016 }
  0xb9   : > { %v2190_v36 = vpop.permute.xlu2 %1061 }
  0xbf   : > { %v2188_v32 = vpop.permute.xlu0 %772 }
  0xc0   : > { %2663 = vst [vmem:[#allocation22_spill] sm:$0xff] %v2188_v32  ;;  %v1038_v33 = vpop.permute.xlu1 %1037 }
  0xc1   : > { %v1042_v34 = vsel %vm1041_vm2, %v1038_v33, %v1040_v31  ;;  %v1043_v35 = vsel %vm1041_vm2, %v1040_v31, %v1038_v33  ;;  %v1076_v56 = vpop.permute.xlu2 %1075  ;;  %vm673_vm2 = vcmp.lt.s32.totalorder %v2185_v30, 127 }
  0xc2   : > { %v1047_v22 = vmul.f32 %v1045_v12, %v1043_v35  ;;  %v1069_v35 = vld [vmem:[#allocation8 + $0x40] sm:$0xff] }
  0xc7   : > { %v1015_v37 = vpop.permute.xlu0 %1014  ;;  %v569_v39 = vpop.f32.mrf.mxu0 }
  0xc8   : > { %v1052_v38 = vpop.permute.xlu1 %1051  ;;  %v582_v40 = vpop.f32.mrf.mxu1  ;;  %v1019_v41 = vsel %vm1018_vm3, %v1015_v37, %v1017_v29  ;;  %v1020_v42 = vsel %vm1018_vm3, %v1017_v29, %v1015_v37  ;;  %v570_v43 = vadd.f32 %v569_v39, %v547_v28  ;;  %vm1173_vm3 = vcmp.lt.s32.totalorder %v2185_v30, 126 }
  0xc9   : > { %v583_v44 = vadd.f32 %v582_v40, %v547_v28  ;;  %v1023_v52 = vmul.f32 %v1021_v45, %v1020_v42  ;;  %v1024_v57 = vmul.f32 %v1022_v49, %v1019_v41  ;;  %v1081_v40 = vld [vmem:[#allocation8 + $0x50] sm:$0xff]  ;;  %v1082_v41 = vld [vmem:[#allocation8 + $0x58] sm:$0xff]  ;;  %v1097_v49 = vpop.permute.xlu2 %1096 }
  0xca   : > { %v586_v46 = vmul.f32 0.1, %v570_v43 }
  0xcb   : > { %v587_v47 = vmul.f32 0.1, %v583_v44 }
  0xcc   : > { %v2196_v50 = vmax.f32 %v570_v43, %v586_v46 }
  0xcd   : > { %v2198_v51 = vmax.f32 %v583_v44, %v587_v47 }
  0xce   : > { %v767_v59 = vpack.c.bf16 %v2196_v50, %v2196_v50  ;;  %590 = vrot.lane.b32.xlu0 %v2196_v50, %s1887_s15 }
  0xcf   : > { %592 = vrot.lane.b32.xlu1 %v2198_v51, %s1887_s15  ;;  %610 = vrot.lane.b32.xlu2 %v2198_v51, %s1889_s19  ;;  %v1028_v58 = vpop.permute.xlu0 %1027  ;;  %v768_v60 = vpack.c.bf16 %v2198_v51, %v2198_v51  ;;  %v571_v62 = vpop.f32.mrf.mxu0 }
  0xd0   : > { %v1074_v61 = vpop.permute.xlu1 %1073  ;;  %v584_v63 = vpop.f32.mrf.mxu1  ;;  %v1030_v0 = vsel %vm1029_vm4, %v1026_v26, %v1028_v58  ;;  %v1031_v1 = vsel %vm1029_vm4, %v1028_v58, %v1026_v26  ;;  %v781_v8 = vsel %vm779_vm6, %v767_v59, 0  ;;  %v1048_v26 = vmul.f32 %v1046_v14, %v1042_v34  ;;  %v1070_v34 = vld [vmem:[#allocation8 + $0x48] sm:$0xff]  ;;  %v1092_v62 = vld [vmem:[#allocation8 + $0x60] sm:$0xff] }
  0xd1   : > { %v1078_v4 = vsel %vm1077_vm5, %v1074_v61, %v1076_v56  ;;  %v1079_v5 = vsel %vm1077_vm5, %v1076_v56, %v1074_v61  ;;  %v1035_v6 = vmul.f32 %v1033_v53, %v1031_v1  ;;  %v1036_v7 = vmul.f32 %v1034_v54, %v1030_v0  ;;  %793 = vmatpush.bf16.msra.mxu2 %v781_v8  ;;  %v1110_v59 = vpop.permute.xlu2 %1109  ;;  %v1093_v63 = vld [vmem:[#allocation8 + $0x68] sm:$0xff]  ;;  %v1103_v0 = vld [vmem:[#allocation8 + $0x70] sm:$0xff]  ;;  %v1104_v1 = vld [vmem:[#allocation8 + $0x78] sm:$0xff] }
  0xd2   : > { %v784_v9 = vsel %vm779_vm6, %v768_v60, 0  ;;  %v1083_v44 = vmul.f32 %v1081_v40, %v1079_v5  ;;  %v1084_v45 = vmul.f32 %v1082_v41, %v1078_v4  ;;  %vm1185_vm4 = vcmp.lt.s32.totalorder %v2185_v30, 114 }
  0xd3   : > { %806 = vmatpush.bf16.msra.mxu3 %v784_v9  ;;  %v1298_v10 = vadd.f32 %v1035_v6, %v1023_v52  ;;  %v1299_v11 = vadd.f32 %v1036_v7, %v1024_v57  ;;  %vm690_vm5 = vcmp.lt.s32.totalorder %v2185_v30, 113 }
  0xd4   : > { %1555 = vmatmul.msk.bf16.vlgmr.msra.gmra.mxu2 %vm775_vm7, %v766_v55 }
  0xd6   : > { %1556 = vmatmul.msk.bf16.vlgmr.msra.gmra.mxu3 %vm775_vm7, %v766_v55  ;;  %627 = vrot.lane.b32.xlu0 %v2198_v51, %s1888_s21 }
  0xd7   : > { %625 = vrot.lane.b32.xlu2 %v2196_v50, %s1888_s21  ;;  %608 = vrot.lane.b32.xlu1 %v2196_v50, %s1889_s19  ;;  %v1050_v27 = vpop.permute.xlu0 %1049 }
  0xd8   : > { %v1054_v28 = vsel %vm1053_vm8, %v1050_v27, %v1052_v38  ;;  %v1055_v29 = vsel %vm1053_vm8, %v1052_v38, %v1050_v27  ;;  %v1088_v48 = vpop.permute.xlu1 %1087  ;;  %vm707_vm8 = vcmp.lt.s32.totalorder %v2185_v30, 112 }
  0xd9   : > { %v1059_v31 = vmul.f32 %v1057_v16, %v1055_v29  ;;  %v1060_v33 = vmul.f32 %v1058_v19, %v1054_v28  ;;  %v1114_v19 = vld [vmem:[#allocation8 + $0x80] sm:$0xff]  ;;  %v1126_v29 = vld [vmem:[#allocation8 + $0x90] sm:$0xff] }
  0xdb   : > { %v1300_v37 = vadd.f32 %v1059_v31, %v1047_v22  ;;  %v1301_v39 = vadd.f32 %v1060_v33, %v1048_v26  ;;  %v1115_v22 = vld [vmem:[#allocation8 + $0x88] sm:$0xff]  ;;  %v1127_v31 = vld [vmem:[#allocation8 + $0x98] sm:$0xff] }
  0xdd   : > { %v2231_v42 = vadd.f32 %v1300_v37, %v1298_v10  ;;  %v2233_v43 = vadd.f32 %v1301_v39, %v1299_v11  ;;  %v1131_v10 = vpop.permute.xlu2 %1130 }
  0xde   : > { %669 = vrot.lane.b32.xlu0 %v2196_v50, %s1893_s22 }
  0xdf   : > { %644 = vrot.lane.b32.xlu2 %v2198_v51, %s1891_s26  ;;  %642 = vrot.lane.b32.xlu1 %v2196_v50, %s1891_s26  ;;  %v1064_v38 = vpop.permute.xlu0 %1063 }
  0xe0   : > { %v1066_v46 = vsel %vm1065_vm9, %v2190_v36, %v1064_v38  ;;  %v1067_v47 = vsel %vm1065_vm9, %v1064_v38, %v2190_v36  ;;  %v1108_v58 = vpop.permute.xlu1 %1107  ;;  %vm724_vm9 = vcmp.lt.s32.totalorder %v2185_v30, 111 }
  0xe1   : > { %v1071_v52 = vmul.f32 %v1069_v35, %v1067_v47  ;;  %v1072_v53 = vmul.f32 %v1070_v34, %v1066_v46  ;;  %v1111_v60 = vsel %vm629_vm11, %v1108_v58, %v1110_v59  ;;  %v1112_v61 = vsel %vm629_vm11, %v1110_v59, %v1108_v58 }
  0xe2   : > { %v1116_v28 = vmul.f32 %v1114_v19, %v1112_v61  ;;  %v1117_v33 = vmul.f32 %v1115_v22, %v1111_v60 }
  0xe3   : > { %v1302_v54 = vadd.f32 %v1083_v44, %v1071_v52  ;;  %v1303_v55 = vadd.f32 %v1084_v45, %v1072_v53  ;;  %v1138_v52 = vld [vmem:[#allocation8 + $0xa0] sm:$0xff]  ;;  %v1139_v53 = vld [vmem:[#allocation8 + $0xa8] sm:$0xff] }
  0xe5   : > { %v1145_v38 = vpop.permute.xlu2 %1144 }
  0xe6   : > { %688 = vrot.lane.b32.xlu0 %v2198_v51, %s1896_s23 }
  0xe7   : > { %686 = vrot.lane.b32.xlu2 %v2196_v50, %s1896_s23  ;;  %671 = vrot.lane.b32.xlu1 %v2198_v51, %s1893_s22  ;;  %v1086_v56 = vpop.permute.xlu0 %1085 }
  0xe8   : > { %v1089_v36 = vsel %vm596_vm10, %v1086_v56, %v1088_v48  ;;  %v1090_v57 = vsel %vm596_vm10, %v1088_v48, %v1086_v56  ;;  %v1121_v9 = vpop.permute.xlu1 %1120  ;;  %v1149_v48 = vld [vmem:[#allocation8 + $0xb0] sm:$0xff] }
  0xe9   : > { %v1094_v4 = vmul.f32 %v1092_v62, %v1090_v57  ;;  %v1095_v5 = vmul.f32 %v1093_v63, %v1089_v36 }
  0xee   : > { %1193 = vrot.lane.b32.xlu0 %v2106_v2, %s1896_s23 }
  0xef   : > { %705 = vrot.lane.b32.xlu2 %v2198_v51, %s1897_s24  ;;  %703 = vrot.lane.b32.xlu1 %v2196_v50, %s1897_s24  ;;  %v1099_v6 = vpop.permute.xlu0 %1098 }
  0xf0   : > { %v1100_v7 = vsel %vm612_vm12, %v1097_v49, %v1099_v6  ;;  %v1101_v8 = vsel %vm612_vm12, %v1099_v6, %v1097_v49  ;;  %v1143_v34 = vpop.permute.xlu1 %1142  ;;  %v1150_v49 = vld [vmem:[#allocation8 + $0xb8] sm:$0xff]  ;;  %v1170_v6 = vpop.permute.xlu2 %1169 }
  0xf1   : > { %v1105_v11 = vmul.f32 %v1103_v0, %v1101_v8  ;;  %v1106_v12 = vmul.f32 %v1104_v1, %v1100_v7  ;;  %v1146_v46 = vsel %vm646_vm14, %v1143_v34, %v1145_v38 }
  0xf3   : > { %v1304_v14 = vadd.f32 %v1105_v11, %v1094_v4  ;;  %v1305_v16 = vadd.f32 %v1106_v12, %v1095_v5  ;;  %v2327_v12 = vld.sshfl [vmem:[#allocation1] sm:$0xff pattern:$0x73625140] }
  0xf5   : > { %v1324_v26 = vadd.f32 %v1304_v14, %v1302_v54  ;;  %v1325_v27 = vadd.f32 %v1305_v16, %v1303_v55  ;;  %v1152_v55 = vmul.f32 %v1150_v49, %v1146_v46  ;;  %v664_v14 = vld.sshfl [vmem:[#allocation1 + $0x8] sm:$0xff pattern:$0x73625140]  ;;  %v677_v16 = vld [vmem:[#allocation5 + $0x14] sm:$0xf]  ;;  %v1165_v49 = vld [vmem:[#allocation8 + $0xd0] sm:$0xff] }
  0xf6   : > { %720 = vrot.lane.b32.xlu0 %v2196_v50, %s1898_s25  ;;  %679 = vst [vmem:[#allocation1] ss:$4 sm:$0xff] %v677_v16 }
  0xf7   : > { %1183 = vrot.lane.b32.xlu2 %v2108_v3, %s1894_s10  ;;  %722 = vrot.lane.b32.xlu1 %v2198_v51, %s1898_s25  ;;  %v1119_v37 = vpop.permute.xlu0 %1118  ;;  %v2277_v39 = vadd.f32 %v1324_v26, %v2231_v42  ;;  %v2280_v40 = vadd.f32 %v1325_v27, %v2233_v43  ;;  %v1147_v42 = vsel %vm646_vm14, %v1145_v38, %v1143_v34  ;;  %s1901_s10 = smov 97   ;;  %v694_v27 = vld [vmem:[#allocation5 + $0x18] sm:$0xf] }
  0xf8   : > { %v1123_v41 = vsel %vm1122_vm13, %v1119_v37, %v1121_v9  ;;  %v1124_v35 = vsel %vm1122_vm13, %v1121_v9, %v1119_v37  ;;  %v1151_v54 = vmul.f32 %v1149_v48, %v1147_v42  ;;  %v1161_v0 = vpop.permute.xlu1 %1160  ;;  %v1155_v48 = vld [vmem:[#allocation8 + $0xc8] sm:$0xff]  ;;  %vm1254_vm13 = vcmp.lt.s32.totalorder %v2185_v30, 97 }
  0xf9   : > { %v1128_v44 = vmul.f32 %v1126_v29, %v1124_v35  ;;  %v1129_v45 = vmul.f32 %v1127_v31, %v1123_v41  ;;  %v711_v31 = vld [vmem:[#allocation5 + $0x1c] sm:$0xf] }
  0xfb   : > { %v1306_v47 = vadd.f32 %v1128_v44, %v1116_v28  ;;  %v1307_v43 = vadd.f32 %v1129_v45, %v1117_v33  ;;  %v728_v45 = vld [vmem:[#allocation5 + $0x20] sm:$0xf] }
  0xfd   : > { %v2331_v22 = vld.sshfl [vmem:[#allocation1] sm:$0xff pattern:$0x73625140]  ;;  %v2333_v26 = vld.sshfl [vmem:[#allocation1 + $0x8] sm:$0xff pattern:$0x73625140] }
  0xfe   : > { %1206 = vrot.lane.b32.xlu0 %v2108_v3, %s1897_s24  ;;  %696 = vst [vmem:[#allocation1] ss:$4 sm:$0xff] %v694_v27 }
  0xff   : > { %1195 = vrot.lane.b32.xlu1 %v2108_v3, %s1896_s23  ;;  %1204 = vrot.lane.b32.xlu2 %v2106_v2, %s1897_s24  ;;  %v1133_v56 = vpop.permute.xlu0 %1132 }
 0x100   : > { %v1135_v36 = vsel %vm1134_vm15, %v1131_v10, %v1133_v56  ;;  %v1136_v57 = vsel %vm1134_vm15, %v1133_v56, %v1131_v10  ;;  %v1346_v10 = vld [vmem:[%s2632_s11] sm:$0xff]  ;;  %v1182_v28 = vpop.permute.xlu1 %1181  ;;  %v1190_v56 = vld [vmem:[#allocation8 + $0xf8] sm:$0xff]  ;;  %vm1230_vm15 = vcmp.lt.s32.totalorder %v2185_v30, 110 }
 0x101   : > { %v1140_v58 = vmul.f32 %v1138_v52, %v1136_v57  ;;  %v1141_v59 = vmul.f32 %v1139_v53, %v1135_v36  ;;  %v1166_v52 = vld [vmem:[#allocation8 + $0xd8] sm:$0xff]  ;;  %v1177_v53 = vld [vmem:[#allocation8 + $0xe0] sm:$0xff]  ;;  %v1157_v36 = vmul.f32 %v1155_v48, %v2108_v3 }
 0x103   : > { %v1308_v60 = vadd.f32 %v1151_v54, %v1140_v58  ;;  %v1309_v61 = vadd.f32 %v1152_v55, %v1141_v59  ;;  %v1178_v54 = vld [vmem:[#allocation8 + $0xe8] sm:$0xff]  ;;  %v1189_v55 = vld [vmem:[#allocation8 + $0xf0] sm:$0xff] }
 0x105   : > { %v2296_v62 = vadd.f32 %v1308_v60, %v1306_v47  ;;  %v2298_v63 = vadd.f32 %v1309_v61, %v1307_v43  ;;  %v2335_v33 = vld.sshfl [vmem:[#allocation1] sm:$0xff pattern:$0x73625140]  ;;  %v2337_v37 = vld.sshfl [vmem:[#allocation1 + $0x8] sm:$0xff pattern:$0x73625140] }
 0x106   : > { %1226 = vrot.lane.b32.xlu0 %v2106_v2, %s1899_s3  ;;  %713 = vst [vmem:[#allocation1] ss:$4 sm:$0xff] %v711_v31  ;;  %v1154_v43 = vld [vmem:[#allocation8 + $0xc0] sm:$0xff] }
 0x107   : > { %1215 = vrot.lane.b32.xlu1 %v2106_v2, %s1898_s25  ;;  %1217 = vrot.lane.b32.xlu2 %v2108_v3, %s1898_s25  ;;  %v1159_v1 = vpop.permute.xlu0 %1158  ;;  %v1156_v57 = vmul.f32 %v1154_v43, %v2106_v2 }
 0x108   : > { %v1162_v4 = vsel %vm673_vm2, %v1159_v1, %v1161_v0  ;;  %v1163_v5 = vsel %vm673_vm2, %v1161_v0, %v1159_v1 }
 0x109   : > { %v1167_v58 = vmul.f32 %v1165_v49, %v1162_v4  ;;  %v1168_v59 = vmul.f32 %v1166_v52, %v1163_v5 }
 0x10b   : > { %v1310_v31 = vadd.f32 %v1167_v58, %v1156_v57  ;;  %v2664_v57 = vld [vmem:[#allocation19_spill] sm:$0xff]  ;;  %v2665_v58 = vld [vmem:[#allocation20_spill] sm:$0xff] }
 0x10d   : > { %v2339_v38 = vld.sshfl [vmem:[#allocation1] sm:$0xff pattern:$0x73625140]  ;;  %v2341_v44 = vld.sshfl [vmem:[#allocation1 + $0x8] sm:$0xff pattern:$0x73625140] }
 0x10e   : > { %1240 = vrot.lane.b32.xlu0 %v2108_v3, %s1900_s18  ;;  %730 = vst [vmem:[#allocation1] ss:$4 sm:$0xff] %v728_v45  ;;  %v1311_v45 = vadd.f32 %v1168_v59, %v1157_v36 }
 0x10f   : > { %1228 = vrot.lane.b32.xlu1 %v2108_v3, %s1899_s3  ;;  %1238 = vrot.lane.b32.xlu2 %v2106_v2, %s1900_s18  ;;  %v1172_v7 = vpop.permute.xlu0 %1171  ;;  %s1904_s18 = smov 94  }
 0x110   : > { %v1174_v8 = vsel %vm1173_vm3, %v1170_v6, %v1172_v7  ;;  %v1175_v9 = vsel %vm1173_vm3, %v1172_v7, %v1170_v6  ;;  %vm1278_vm3 = vcmp.lt.s32.totalorder %v2185_v30, 95 }
 0x111   : > { %v1179_v7 = vmul.f32 %v1177_v53, %v1174_v8  ;;  %v668_v8 = vmul.f32 %v664_v14, %v2198_v51 }
 0x116   : > { %1262 = vrot.lane.b32.xlu0 %v2106_v2, %s1902_s14 }
 0x117   : > { %1250 = vrot.lane.b32.xlu1 %v2106_v2, %s1901_s10  ;;  %1252 = vrot.lane.b32.xlu2 %v2108_v3, %s1901_s10 }
 0x11e   : > { %1276 = vrot.lane.b32.xlu0 %v2108_v3, %s1903_s28 }
 0x11f   : > { %1264 = vrot.lane.b32.xlu1 %v2108_v3, %s1902_s14  ;;  %1274 = vrot.lane.b32.xlu2 %v2106_v2, %s1903_s28 }
 0x126   : > { %1349 = vperm.xlu0 %1674, %v1346_v10   ;;  %v1180_v10 = vmul.f32 %v1178_v54, %v1175_v9 }
 0x127   : > { %1286 = vrot.lane.b32.xlu1 %v2106_v2, %s1904_s18  ;;  %1288 = vrot.lane.b32.xlu2 %v2108_v3, %s1904_s18  ;;  %s2668_s18 = sld [smem:[#allocation26_spill]] }
 0x129   : > { %v2325_v11 = vpop.permute.xlu2 %610 }
 0x131   : > { %v2329_v19 = vpop.permute.xlu2 %625 }
 0x139   : > { %v645_v29 = vpop.permute.xlu2 %644 }
 0x140   : > { %v591_v34 = vpop.permute.xlu0 %590 }
 0x141   : > { %v593_v41 = vpop.permute.xlu1 %592  ;;  %v687_v35 = vpop.permute.xlu2 %686 }
 0x142   : > { %v598_v51 = vsel %vm596_vm10, %v593_v41, %v591_v34 }
 0x148   : > { %v628_v47 = vpop.permute.xlu0 %627 }
 0x149   : > { %v2343_v46 = vpop.permute.xlu2 %705  ;;  %v609_v42 = vpop.permute.xlu1 %608 }
 0x150   : > { %v670_v6 = vpop.permute.xlu0 %669 }
 0x151   : > { %v1184_v60 = vpop.permute.xlu2 %1183  ;;  %v643_v61 = vpop.permute.xlu1 %642 }
 0x152   : > { %v1186_v0 = vsel %vm1185_vm4, %v1182_v28, %v1184_v60  ;;  %v1187_v1 = vsel %vm1185_vm4, %v1184_v60, %v1182_v28  ;;  %v648_v48 = vsel %vm646_vm14, %v645_v29, %v643_v61  ;;  %vm1290_vm4 = vcmp.lt.s32.totalorder %v2185_v30, 94 }
 0x153   : > { %v1191_v16 = vmul.f32 %v1189_v55, %v1186_v0  ;;  %v1192_v27 = vmul.f32 %v1190_v56, %v1187_v1  ;;  %v657_v49 = vmul.f32 %v2181_v24, %v648_v48 }
 0x155   : > { %v1312_v32 = vadd.f32 %v1191_v16, %v1179_v7  ;;  %v1313_v23 = vadd.f32 %v1192_v27, %v1180_v10  ;;  %v732_v7 = vld.sshfl [vmem:[#allocation1 + $0x8] sm:$0xff pattern:$0x73625140] }
 0x157   : > { %v1328_v15 = vadd.f32 %v1312_v32, %v1310_v31  ;;  %v1329_v13 = vadd.f32 %v1313_v23, %v1311_v45  ;;  %v2348_v3 = vpop.f32.mrf.mxu2  ;;  %v647_v23 = vsel %vm646_vm14, %v643_v61, %v645_v29 }
 0x158   : > { %v689_v43 = vpop.permute.xlu0 %688 }
 0x159   : > { %v2350_v2 = vpop.f32.mrf.mxu3  ;;  %v672_v4 = vpop.permute.xlu1 %671  ;;  %v1336_v5 = vadd.f32 %v1328_v15, %v2296_v62  ;;  %v1337_v28 = vadd.f32 %v1329_v13, %v2298_v63  ;;  %v667_v13 = vmul.f32 %v2327_v12, %v2196_v50  ;;  %v597_v15 = vsel %vm596_vm10, %v591_v34, %v593_v41 }
 0x15a   : > { %v613_v62 = vsel %vm612_vm12, %v609_v42, %v2325_v11  ;;  %v614_v50 = vsel %vm612_vm12, %v2325_v11, %v609_v42  ;;  %v691_v63 = vsel %vm690_vm5, %v687_v35, %v689_v43  ;;  %v692_v12 = vsel %vm690_vm5, %v689_v43, %v687_v35  ;;  %v2415_v61 = vpop.permute.xlu2 %1204 }
 0x15b   : > { %v2357_v9 = vadd.f32 %v1336_v5, %v2277_v39  ;;  %v2360_v32 = vadd.f32 %v1337_v28, %v2280_v40  ;;  %v674_v39 = vsel %vm673_vm2, %v670_v6, %v672_v4  ;;  %v675_v40 = vsel %vm673_vm2, %v672_v4, %v670_v6 }
 0x15c   : > { %v630_v41 = vsel %vm629_vm11, %v2329_v19, %v628_v47  ;;  %v631_v34 = vsel %vm629_vm11, %v628_v47, %v2329_v19  ;;  %v658_v11 = vmul.f32 %v2183_v25, %v647_v23  ;;  %v684_v52 = vmul.f32 %v2331_v22, %v674_v39 }
 0x15d   : > { %v685_v53 = vmul.f32 %v2333_v26, %v675_v40  ;;  %v701_v19 = vmul.f32 %v2335_v33, %v691_v63  ;;  %v702_v24 = vmul.f32 %v2337_v37, %v692_v12  ;;  %v623_v26 = vmul.f32 %v2170_v17, %v614_v50 }
 0x15e   : > { %v624_v47 = vmul.f32 %v2172_v18, %v613_v62  ;;  %v640_v56 = vmul.f32 %v2175_v20, %v631_v34  ;;  %v641_v36 = vmul.f32 %v2177_v21, %v630_v41  ;;  %v607_v59 = vmul.f32 %v2665_v58, %v597_v15  ;;  %v731_v21 = vld.sshfl [vmem:[#allocation1] sm:$0xff pattern:$0x73625140]  ;;  %v1247_v58 = vld [vmem:[#allocation8 + $0x148] sm:$0xff] }
 0x15f   : > { %v797_v14 = vpop.f32.mrf.mxu2  ;;  %v741_v0 = vadd.f32 %v684_v52, %v667_v13  ;;  %v2666_v13 = vld [vmem:[#allocation21_spill] sm:$0xff] }
 0x160   : > { %v2403_v55 = vpop.permute.xlu0 %1193  ;;  %v739_v37 = vadd.f32 %v657_v49, %v640_v56  ;;  %v738_v18 = vadd.f32 %v624_v47, %v607_v59  ;;  %v812_v14 = vld [vmem:[%s2627_s6] sm:$0x3]  ;;  %v1201_v47 = vld [vmem:[#allocation8 + $0x108] sm:$0xff] }
 0x161   : > { %v810_v29 = vpop.f32.mrf.mxu3  ;;  %v704_v42 = vpop.permute.xlu1 %703 }
 0x162   : > { %v708_v35 = vsel %vm707_vm8, %v704_v42, %v2343_v46  ;;  %v709_v54 = vsel %vm707_vm8, %v2343_v46, %v704_v42  ;;  %v606_v46 = vmul.f32 %v2664_v57, %v598_v51  ;;  %v1218_v48 = vpop.permute.xlu2 %1217  ;;  %v1222_v57 = vld [vmem:[#allocation8 + $0x120] sm:$0xff] }
 0x163   : > { %v718_v25 = vmul.f32 %v2339_v38, %v708_v35  ;;  %v719_v22 = vmul.f32 %v2341_v44, %v709_v54  ;;  %v740_v38 = vadd.f32 %v658_v11, %v641_v36  ;;  %v742_v44 = vadd.f32 %v685_v53, %v668_v8 }
 0x164   : > { %v737_v17 = vadd.f32 %v623_v26, %v606_v46  ;;  %v813_v11 = vpack.c.bf16 %v812_v14, %v812_v14  ;;  %v1246_v46 = vld [vmem:[#allocation8 + $0x140] sm:$0xff] }
 0x165   : > { %v743_v60 = vadd.f32 %v718_v25, %v701_v19  ;;  %v744_v33 = vadd.f32 %v719_v22, %v702_v24  ;;  %v746_v16 = vadd.f32 %v740_v38, %v738_v18  ;;  %v1200_v24 = vld [vmem:[#allocation8 + $0x100] sm:$0xff] }
 0x166   : > { %v745_v10 = vadd.f32 %v739_v37, %v737_v17  ;;  %v1259_v37 = vld [vmem:[#allocation8 + $0x158] sm:$0xff]  ;;  %v1223_v17 = vld [vmem:[#allocation8 + $0x128] sm:$0xff] }
 0x167   : > { %v747_v1 = vadd.f32 %v743_v60, %v741_v0  ;;  %v748_v20 = vadd.f32 %v744_v33, %v742_v44  ;;  %v1258_v33 = vld [vmem:[#allocation8 + $0x150] sm:$0xff] }
 0x168   : > { %v721_v27 = vpop.permute.xlu0 %720 }
 0x169   : > { %v723_v6 = vpop.permute.xlu1 %722  ;;  %v750_v4 = vadd.f32 %v748_v20, %v746_v16  ;;  %v749_v43 = vadd.f32 %v747_v1, %v745_v10  ;;  %v1234_v1 = vld [vmem:[#allocation8 + $0x130] sm:$0xff]  ;;  %v1235_v20 = vld [vmem:[#allocation8 + $0x138] sm:$0xff] }
 0x16a   : > { %v725_v31 = vsel %vm724_vm9, %v721_v27, %v723_v6  ;;  %v726_v45 = vsel %vm724_vm9, %v723_v6, %v721_v27  ;;  %v1239_v52 = vpop.permute.xlu2 %1238  ;;  %v1211_v10 = vld [vmem:[#allocation8 + $0x110] sm:$0xff]  ;;  %v1212_v16 = vld [vmem:[#allocation8 + $0x118] sm:$0xff] }
 0x16b   : > { %v735_v5 = vmul.f32 %v731_v21, %v725_v31  ;;  %v736_v28 = vmul.f32 %v732_v7, %v726_v45 }
 0x16d   : > { %v751_v8 = vadd.f32 %v749_v43, %v735_v5  ;;  %v752_v23 = vadd.f32 %v750_v4, %v736_v28  ;;  %v1270_v43 = vld [vmem:[#allocation8 + $0x160] sm:$0xff] }
 0x16f   : > { %v759_v15 = vadd.f32 %v2666_v13, %v751_v8  ;;  %v760_v51 = vadd.f32 %v2666_v13, %v752_v23  ;;  %v1271_v8 = vld [vmem:[#allocation8 + $0x168] sm:$0xff] }
 0x170   : > { %v1207_v40 = vpop.permute.xlu0 %1206 }
 0x171   : > { %v1196_v39 = vpop.permute.xlu1 %1195  ;;  %v761_v62 = vmul.f32 0.1, %v759_v15  ;;  %v762_v50 = vmul.f32 0.1, %v760_v51  ;;  %v1208_v27 = vsel %vm707_vm8, %v2415_v61, %v1207_v40  ;;  %v1209_v31 = vsel %vm707_vm8, %v1207_v40, %v2415_v61 }
 0x172   : > { %v1253_v19 = vpop.permute.xlu2 %1252  ;;  %v1197_v25 = vsel %vm690_vm5, %v2403_v55, %v1196_v39  ;;  %v1198_v56 = vsel %vm690_vm5, %v1196_v39, %v2403_v55  ;;  %v1282_v39 = vld [vmem:[#allocation8 + $0x170] sm:$0xff] }
 0x173   : > { %v763_v63 = vmax.f32 %v759_v15, %v761_v62  ;;  %v764_v12 = vmax.f32 %v760_v51, %v762_v50  ;;  %v1202_v36 = vmul.f32 %v1200_v24, %v1197_v25  ;;  %v1203_v7 = vmul.f32 %v1201_v47, %v1198_v56  ;;  %v1283_v62 = vld [vmem:[#allocation8 + $0x178] sm:$0xff]  ;;  %v1294_v56 = vld [vmem:[#allocation8 + $0x180] sm:$0xff] }
 0x174   : > { %v1213_v50 = vmul.f32 %v1211_v10, %v1208_v27  ;;  %v859_v27 = vld [vmem:[#allocation7] sm:$0xf] }
 0x175   : > { %v814_v29 = vpack.c.bf16 %v763_v63, %v763_v63  ;;  %v815_v41 = vpack.c.bf16 %v764_v12, %v764_v12  ;;  %v1214_v63 = vmul.f32 %v1212_v16, %v1209_v31  ;;  %861 = vst [vmem:[#allocation1] ss:$4 sm:$0xff] %v859_v27 }
 0x176   : > { %v1314_v24 = vadd.f32 %v1213_v50, %v1202_v36 }
 0x177   : > { %v820_v34 = vsel %vm779_vm6, %v814_v29, 0  ;;  %v823_v49 = vsel %vm779_vm6, %v815_v41, 0  ;;  %vm1242_vm6 = vcmp.lt.s32.totalorder %v2185_v30, 98  ;;  %v1315_v25 = vadd.f32 %v1214_v63, %v1203_v7 }
 0x178   : > { %832 = vmatpush.bf16.msrb.mxu0 %v820_v34  ;;  %845 = vmatpush.bf16.msrb.mxu1 %v823_v49  ;;  %v1227_v53 = vpop.permute.xlu0 %1226 }
 0x179   : > { %v1216_v42 = vpop.permute.xlu1 %1215 }
 0x17a   : > { %v1275_v44 = vpop.permute.xlu2 %1274  ;;  %v1219_v18 = vsel %vm724_vm9, %v1216_v42, %v1218_v48  ;;  %v1220_v55 = vsel %vm724_vm9, %v1218_v48, %v1216_v42 }
 0x17b   : > { %1557 = vmatmul.msk.bf16.vlgmr.msrb.gmra.mxu0 %vm775_vm7, %v813_v11  ;;  %1558 = vmatmul.msk.bf16.vlgmr.msrb.gmra.mxu1 %vm775_vm7, %v813_v11  ;;  %vm1266_vm7 = vcmp.lt.s32.totalorder %v2185_v30, 96  ;;  %v1224_v23 = vmul.f32 %v1222_v57, %v1219_v18  ;;  %v1225_v48 = vmul.f32 %v1223_v17, %v1220_v55  ;;  %v1295_v57 = vld [vmem:[#allocation8 + $0x188] sm:$0xff] }
 0x17c   : > { %v2469_v31 = vld.sshfl [vmem:[#allocation1] sm:$0xff pattern:$0x73625140] }
 0x180   : > { %v1241_v54 = vpop.permute.xlu0 %1240 }
 0x181   : > { %v1229_v35 = vpop.permute.xlu1 %1228  ;;  %v1243_v59 = vsel %vm1242_vm6, %v1239_v52, %v1241_v54  ;;  %v1244_v60 = vsel %vm1242_vm6, %v1241_v54, %v1239_v52 }
 0x182   : > { %v1231_v6 = vsel %vm1230_vm15, %v1227_v53, %v1229_v35  ;;  %v1232_v21 = vsel %vm1230_vm15, %v1229_v35, %v1227_v53  ;;  %v1248_v45 = vmul.f32 %v1246_v46, %v1243_v59  ;;  %v1249_v4 = vmul.f32 %v1247_v58, %v1244_v60 }
 0x183   : > { %v1236_v13 = vmul.f32 %v1234_v1, %v1231_v6  ;;  %v1237_v15 = vmul.f32 %v1235_v20, %v1232_v21 }
 0x185   : > { %v1316_v53 = vadd.f32 %v1236_v13, %v1224_v23  ;;  %v1317_v35 = vadd.f32 %v1237_v15, %v1225_v48  ;;  %v917_v23 = vld [vmem:[#allocation7 + $0x10] sm:$0xf]  ;;  %v1354_v15 = vld [vmem:[%s2633_s12] sm:$0xf] }
 0x187   : > { %v1330_v46 = vadd.f32 %v1316_v53, %v1314_v24  ;;  %v1331_v58 = vadd.f32 %v1317_v35, %v1315_v25  ;;  %v965_v53 = vld [vmem:[#allocation7 + $0x1c] sm:$0xf] }
 0x188   : > { %v1263_v26 = vpop.permute.xlu0 %1262 }
 0x189   : > { %v1251_v22 = vpop.permute.xlu1 %1250 }
 0x18a   : > { %v1255_v38 = vsel %vm1254_vm13, %v1251_v22, %v1253_v19  ;;  %v1256_v0 = vsel %vm1254_vm13, %v1253_v19, %v1251_v22  ;;  %v1289_v22 = vpop.permute.xlu2 %1288 }
 0x18b   : > { %v1260_v5 = vmul.f32 %v1258_v33, %v1255_v38  ;;  %v1261_v28 = vmul.f32 %v1259_v37, %v1256_v0 }
 0x18d   : > { %v1318_v49 = vadd.f32 %v1260_v5, %v1248_v45  ;;  %v1319_v11 = vadd.f32 %v1261_v28, %v1249_v4  ;;  %v2471_v45 = vld.sshfl [vmem:[#allocation1 + $0x8] sm:$0xff pattern:$0x73625140]  ;;  %v907_v28 = vld [vmem:[#allocation7 + $0xc] sm:$0xf] }
 0x190   : > { %v1277_v12 = vpop.permute.xlu0 %1276 }
 0x191   : > { %v1265_v51 = vpop.permute.xlu1 %1264  ;;  %v1279_v41 = vsel %vm1278_vm3, %v1275_v44, %v1277_v12  ;;  %v1280_v34 = vsel %vm1278_vm3, %v1277_v12, %v1275_v44 }
 0x192   : > { %v1267_v61 = vsel %vm1266_vm7, %v1263_v26, %v1265_v51  ;;  %v1268_v40 = vsel %vm1266_vm7, %v1265_v51, %v1263_v26  ;;  %v1284_v42 = vmul.f32 %v1282_v39, %v1279_v41  ;;  %v1285_v52 = vmul.f32 %v1283_v62, %v1280_v34  ;;  %v2667_v39 = vld [vmem:[#allocation22_spill] sm:$0xff] }
 0x193   : > { %v1272_v14 = vmul.f32 %v1270_v43, %v1267_v61  ;;  %v1273_v29 = vmul.f32 %v1271_v8, %v1268_v40  ;;  %v1355_v51 = vpack.c.bf16 %v1354_v15, %v1354_v15  ;;  %v796_v62 = vadd.f32 %v2348_v3, %v2667_v39 }
 0x194   : > { %v809_v50 = vadd.f32 %v2350_v2, %v2667_v39  ;;  %v1358_v2 = vld [vmem:[%s2634_s13] sm:$0xf] }
 0x195   : > { %v1320_v54 = vadd.f32 %v1284_v42, %v1272_v14  ;;  %v1321_v19 = vadd.f32 %v1285_v52, %v1273_v29  ;;  %v1006_v29 = vld [vmem:[%s2630_s9] sm:$0x3]  ;;  %v949_v52 = vld [vmem:[#allocation7 + $0x18] sm:$0xf] }
 0x197   : > { %v1332_v26 = vadd.f32 %v1320_v54, %v1318_v49  ;;  %v1333_v47 = vadd.f32 %v1321_v19, %v1319_v11  ;;  %v933_v49 = vld [vmem:[#allocation7 + $0x14] sm:$0xf] }
 0x198   : > { %v1350_v1 = vpop.permute.xlu0 %1349 }
 0x199   : > { %v1287_v59 = vpop.permute.xlu1 %1286  ;;  %v1338_v0 = vadd.f32 %v1332_v26, %v1330_v46  ;;  %v1339_v44 = vadd.f32 %v1333_v47, %v1331_v58  ;;  %v981_v46 = vld [vmem:[#allocation7 + $0x20] sm:$0xf] }
 0x19a   : > { %v1291_v60 = vsel %vm1290_vm4, %v1287_v59, %v1289_v22  ;;  %v1292_v33 = vsel %vm1290_vm4, %v1289_v22, %v1287_v59 }
 0x19b   : > { %v1296_v37 = vmul.f32 %v1294_v56, %v1291_v60  ;;  %v1297_v38 = vmul.f32 %v1295_v57, %v1292_v33 }
 0x19d   : > { %v1342_v17 = vadd.f32 %v1338_v0, %v1296_v37  ;;  %v1343_v18 = vadd.f32 %v1339_v44, %v1297_v38 }
 0x19f   : > { %v1344_v36 = vadd.f32 %v1342_v17, %v2357_v9  ;;  %v1345_v55 = vadd.f32 %v1343_v18, %v2360_v32  ;;  %v875_v9 = vld [vmem:[#allocation7 + $0x4] sm:$0xf]  ;;  %v891_v32 = vld [vmem:[#allocation7 + $0x8] sm:$0xf] }
 0x1a0   : > { %877 = vst [vmem:[#allocation1] ss:$4 sm:$0xff] %v875_v9 }
 0x1a1   : > { %v1352_v20 = vadd.f32 %v1350_v1, %v1344_v36  ;;  %v1353_v6 = vadd.f32 %v1350_v1, %v1345_v55 }
 0x1a3   : > { %v1356_v21 = vpack.c.bf16 %v1352_v20, %v1352_v20  ;;  %v1357_v7 = vpack.c.bf16 %v1353_v6, %v1353_v6 }
 0x1a5   : > { %v1368_v10 = vsel %vm553_vm0, %v1356_v21, 0  ;;  %v1371_v16 = vsel %vm553_vm0, %v1357_v7, 0 }
 0x1a6   : > { %1380 = vmatpush.bf16.msrb.mxu2 %v1368_v10  ;;  %1393 = vmatpush.bf16.msrb.mxu3 %v1371_v16 }
 0x1a7   : > { %v2473_v4 = vld.sshfl [vmem:[#allocation1] sm:$0xff pattern:$0x73625140]  ;;  %v2475_v5 = vld.sshfl [vmem:[#allocation1 + $0x8] sm:$0xff pattern:$0x73625140] }
 0x1a8   : > { %893 = vst [vmem:[#allocation1] ss:$4 sm:$0xff] %v891_v32 }
 0x1a9   : > { %1559 = vmatmul.msk.bf16.vlgmr.msrb.gmra.mxu2 %vm549_vm1, %v1355_v51  ;;  %1560 = vmatmul.msk.bf16.vlgmr.msrb.gmra.mxu3 %vm549_vm1, %v1355_v51 }
 0x1af   : > { %v2477_v43 = vld.sshfl [vmem:[#allocation1] sm:$0xff pattern:$0x73625140]  ;;  %v2479_v8 = vld.sshfl [vmem:[#allocation1 + $0x8] sm:$0xff pattern:$0x73625140] }
 0x1b0   : > { %909 = vst [vmem:[#allocation1] ss:$4 sm:$0xff] %v907_v28 }
 0x1b7   : > { %v2481_v48 = vld.sshfl [vmem:[#allocation1] sm:$0xff pattern:$0x73625140]  ;;  %v2483_v13 = vld.sshfl [vmem:[#allocation1 + $0x8] sm:$0xff pattern:$0x73625140] }
 0x1b8   : > { %919 = vst [vmem:[#allocation1] ss:$4 sm:$0xff] %v917_v23 }
 0x1bf   : > { %v920_v41 = vld.sshfl [vmem:[#allocation1] sm:$0xff pattern:$0x73625140]  ;;  %v921_v34 = vld.sshfl [vmem:[#allocation1 + $0x8] sm:$0xff pattern:$0x73625140] }
 0x1c0   : > { %935 = vst [vmem:[#allocation1] ss:$4 sm:$0xff] %v933_v49 }
 0x1c7   : > { %v936_v11 = vld.sshfl [vmem:[#allocation1] sm:$0xff pattern:$0x73625140]  ;;  %v937_v42 = vld.sshfl [vmem:[#allocation1 + $0x8] sm:$0xff pattern:$0x73625140] }
 0x1c8   : > { %951 = vst [vmem:[#allocation1] ss:$4 sm:$0xff] %v949_v52 }
 0x1cf   : > { %v952_v35 = vld.sshfl [vmem:[#allocation1] sm:$0xff pattern:$0x73625140]  ;;  %v953_v54 = vld.sshfl [vmem:[#allocation1 + $0x8] sm:$0xff pattern:$0x73625140] }
 0x1d0   : > { %967 = vst [vmem:[#allocation1] ss:$4 sm:$0xff] %v965_v53 }
 0x1d7   : > { %v968_v56 = vld.sshfl [vmem:[#allocation1] sm:$0xff pattern:$0x73625140]  ;;  %v969_v57 = vld.sshfl [vmem:[#allocation1 + $0x8] sm:$0xff pattern:$0x73625140] }
 0x1d8   : > { %983 = vst [vmem:[#allocation1] ss:$4 sm:$0xff] %v981_v46 }
 0x1f8   : > { %v834_v63 = vpop.f32.mrf.mxu0  ;;  %v847_v61 = vpop.f32.mrf.mxu1 }
 0x1f9   : > { %v2494_v40 = vadd.f32 %v834_v63, %v796_v62  ;;  %v2496_v12 = vadd.f32 %v847_v61, %v809_v50 }
 0x1fb   : > { %855 = vrot.lane.b32.xlu2 %v2496_v12, %s1887_s15  ;;  %884 = vrot.lane.b32.xlu0 %v2494_v40, %s1888_s21  ;;  %v925_v55 = vmul.f32 %v921_v34, %v2496_v12  ;;  %v924_v1 = vmul.f32 %v920_v41, %v2494_v40 }
 0x1fc   : > { %853 = vrot.lane.b32.xlu1 %v2494_v40, %s1887_s15 }
 0x200   : > { %v836_v14 = vpop.f32.mrf.mxu0  ;;  %v849_v3 = vpop.f32.mrf.mxu1 }
 0x203   : > { %870 = vrot.lane.b32.xlu2 %v2496_v12, %s1889_s19  ;;  %902 = vrot.lane.b32.xlu0 %v2496_v12, %s1891_s26 }
 0x204   : > { %868 = vrot.lane.b32.xlu1 %v2494_v40, %s1889_s19 }
 0x20b   : > { %900 = vrot.lane.b32.xlu2 %v2494_v40, %s1891_s26  ;;  %942 = vrot.lane.b32.xlu0 %v2494_v40, %s1896_s23  ;;  %s1817_s26 = scalar_lea.hbm %s2668_s18, 16 }
 0x20c   : > { %886 = vrot.lane.b32.xlu1 %v2496_v12, %s1888_s21 }
 0x213   : > { %928 = vrot.lane.b32.xlu2 %v2496_v12, %s1893_s22  ;;  %960 = vrot.lane.b32.xlu0 %v2496_v12, %s1897_s24 }
 0x214   : > { %926 = vrot.lane.b32.xlu1 %v2494_v40, %s1893_s22  ;;  %s1552_s22 = sshll.u32 %s2087_s27, 3 }
 0x21b   : > { %958 = vrot.lane.b32.xlu2 %v2494_v40, %s1897_s24  ;;  %1361 = vperm.xlu0 %1674, %v1358_v2   ;;  %s1567_s24 = sshll.u32 %s2004_s20, 3  ;;  %s1423_s20 = scalar_lea.sflag [#allocation4], %s2087_s27 }
 0x21c   : > { %944 = vrot.lane.b32.xlu1 %v2496_v12, %s1896_s23  ;;  %s2578_s23 = scalar_lea.vmem [#allocation10], %s1552_s22  ;;  %s1434_s10 = scalar_lea.hbm %s2668_s18, %s1567_s24 }
 0x21d   : > { %s1436_s14 = sshll.u32 %s2578_s23, 4  ;;  %s1438_s28 = sshll.u32 %s1434_s10, 4  ;;  %s1437_s14 = int_to_ptr.vmem [resolvable:$true] %s1436_s14  ;;  %s1439_s28 = int_to_ptr.hbm [resolvable:$true] %s1438_s28 }
 0x21e   : > { %s1811_s17 = sshra.s32 %s1439_s28, 4  ;;  %s1812_s17 = int_to_ptr.hbm [resolvable:$true] %s1811_s17 }
 0x21f   : > { %s1813_s15 = scalar_lea.hbm %s1812_s17, 8  ;;  %p1818_p12 = scmp.lt.s32.totalorder %s1812_s17, %s2668_s18 }
 0x220   : > { %p1814_p1 = scmp.ne.s32.totalorder %s1812_s17, %s1813_s15  ;;  %p1819_p8 = scmp.lt.s32.totalorder %s1817_s26, %s1813_s15 }
 0x222   : > { %p1815_p3 = pnand %p1814_p1, %p2056_p13  ;;  %p1820_p7 = por %p1819_p8, %p1818_p12 }
 0x223   : > { %976 = vrot.lane.b32.xlu2 %v2496_v12, %s1898_s25 }
 0x224   : > { %974 = vrot.lane.b32.xlu1 %v2494_v40, %s1898_s25  ;;  %p1816_p5 = pneg %p1815_p3 }
 0x226   : > { %p1821_p9 = pnand %p1820_p7, %p1816_p5 }
 0x22c   : > { %1009 = vperm.xlu1 %1676, %v1006_v29   ;;  %v1382_v24 = vpop.f32.mrf.mxu2  ;;  %v1395_v25 = vpop.f32.mrf.mxu3 }
 0x234   : > { %v1397_v58 = vpop.f32.mrf.mxu3  ;;  %v1384_v59 = vpop.f32.mrf.mxu2 }
 0x255   : > { %v856_v19 = vpop.permute.xlu2 %855 }
 0x25d   : > { %v871_v26 = vpop.permute.xlu2 %870 }
 0x265   : > { %v901_v37 = vpop.permute.xlu2 %900 }
 0x26d   : > { %v885_v22 = vpop.permute.xlu0 %884  ;;  %v929_v44 = vpop.permute.xlu2 %928 }
 0x26e   : > { %v854_v47 = vpop.permute.xlu1 %853 }
 0x26f   : > { %v857_v36 = vsel %vm596_vm10, %v854_v47, %v856_v19  ;;  %v858_v20 = vsel %vm596_vm10, %v856_v19, %v854_v47 }
 0x275   : > { %v903_v60 = vpop.permute.xlu0 %902  ;;  %v959_v6 = vpop.permute.xlu2 %958 }
 0x276   : > { %v869_v33 = vpop.permute.xlu1 %868  ;;  %v904_v21 = vsel %vm646_vm14, %v901_v37, %v903_v60  ;;  %v905_v7 = vsel %vm646_vm14, %v903_v60, %v901_v37 }
 0x277   : > { %v872_v16 = vsel %vm612_vm12, %v869_v33, %v871_v26  ;;  %v873_v50 = vsel %vm612_vm12, %v871_v26, %v869_v33  ;;  %v915_v26 = vmul.f32 %v2483_v13, %v904_v21  ;;  %v984_v13 = vld.sshfl [vmem:[#allocation1] sm:$0xff pattern:$0x73625140] }
 0x278   : > { %v882_v19 = vmul.f32 %v2473_v4, %v873_v50 }
 0x27d   : > { %v943_v38 = vpop.permute.xlu0 %942 }
 0x27e   : > { %v887_v0 = vpop.permute.xlu1 %886 }
 0x27f   : > { %v889_v10 = vsel %vm629_vm11, %v887_v0, %v885_v22  ;;  %v888_v27 = vsel %vm629_vm11, %v885_v22, %v887_v0  ;;  %v914_v22 = vmul.f32 %v2481_v48, %v905_v7 }
 0x280   : > { %v898_v63 = vmul.f32 %v2477_v43, %v889_v10  ;;  %v899_v3 = vmul.f32 %v2479_v8, %v888_v27  ;;  %v883_v43 = vmul.f32 %v2475_v5, %v872_v16 }
 0x285   : > { %v961_v17 = vpop.permute.xlu0 %960 }
 0x286   : > { %v927_v18 = vpop.permute.xlu1 %926  ;;  %v962_v9 = vsel %vm707_vm8, %v959_v6, %v961_v17  ;;  %v963_v32 = vsel %vm707_vm8, %v961_v17, %v959_v6 }
 0x287   : > { %v930_v23 = vsel %vm673_vm2, %v927_v18, %v929_v44  ;;  %v931_v15 = vsel %vm673_vm2, %v929_v44, %v927_v18  ;;  %v972_v2 = vmul.f32 %v968_v56, %v962_v9  ;;  %v973_v29 = vmul.f32 %v969_v57, %v963_v32  ;;  %v985_v57 = vld.sshfl [vmem:[#allocation1 + $0x8] sm:$0xff pattern:$0x73625140] }
 0x288   : > { %v940_v34 = vmul.f32 %v936_v11, %v930_v23  ;;  %v941_v49 = vmul.f32 %v937_v42, %v931_v15  ;;  %v866_v56 = vmul.f32 %v2469_v31, %v858_v20  ;;  %v992_v42 = vadd.f32 %v914_v22, %v898_v63 }
 0x28a   : > { %v994_v4 = vadd.f32 %v940_v34, %v924_v1  ;;  %v990_v5 = vadd.f32 %v882_v19, %v866_v56 }
 0x28c   : > { %v998_v37 = vadd.f32 %v992_v42, %v990_v5 }
 0x28d   : > { %v1362_v28 = vpop.permute.xlu0 %1361 }
 0x28e   : > { %v1383_v51 = vadd.f32 %v1382_v24, %v1362_v28  ;;  %v1396_v39 = vadd.f32 %v1395_v25, %v1362_v28  ;;  %v945_v62 = vpop.permute.xlu1 %944 }
 0x28f   : > { %v946_v61 = vsel %vm690_vm5, %v943_v38, %v945_v62  ;;  %v947_v14 = vsel %vm690_vm5, %v945_v62, %v943_v38 }
 0x290   : > { %v1400_v41 = vadd.f32 %v1396_v39, %v2496_v12  ;;  %v956_v52 = vmul.f32 %v952_v35, %v946_v61  ;;  %v957_v53 = vmul.f32 %v953_v54, %v947_v14  ;;  %v1399_v24 = vadd.f32 %v1383_v51, %v2494_v40  ;;  %v977_v40 = vpop.permute.xlu2 %976 }
 0x291   : > { %v867_v12 = vmul.f32 %v2471_v45, %v857_v36  ;;  %v993_v35 = vadd.f32 %v915_v26, %v899_v3  ;;  %v995_v54 = vadd.f32 %v941_v49, %v925_v55  ;;  %v1410_v55 = vrot.slane %v1396_v39, 2 }
 0x292   : > { %v1403_v25 = vrot.slane %v1400_v41, 4  ;;  %v996_v8 = vadd.f32 %v972_v2, %v956_v52  ;;  %v997_v47 = vadd.f32 %v973_v29, %v957_v53  ;;  %v1409_v30 = vrot.slane %v1383_v51, 2 }
 0x293   : > { %v991_v48 = vadd.f32 %v883_v43, %v867_v12 }
 0x294   : > { %v1404_v11 = vsel %vm553_vm0, %v1399_v24, %v1403_v25  ;;  %v1001_v58 = vadd.f32 %v997_v47, %v995_v54  ;;  %v1000_v59 = vadd.f32 %v996_v8, %v994_v4 }
 0x295   : > { %1406 = vst [vmem:[%s2578_s23] sm:$0x33] %v1404_v11  ;;  %v999_v38 = vadd.f32 %v993_v35, %v991_v48 }
 0x296   : > { %v975_v46 = vpop.permute.xlu1 %974  ;;  %v1002_v44 = vadd.f32 %v1000_v59, %v998_v37 }
 0x297   : > { %v978_v31 = vsel %vm724_vm9, %v975_v46, %v977_v40  ;;  %v979_v45 = vsel %vm724_vm9, %v977_v40, %v975_v46  ;;  %v1003_v0 = vadd.f32 %v1001_v58, %v999_v38 }
 0x298   : > { %v988_v60 = vmul.f32 %v984_v13, %v978_v31  ;;  %v989_v33 = vmul.f32 %v985_v57, %v979_v45 }
 0x29a   : > { %v1005_v17 = vadd.f32 %v1003_v0, %v989_v33  ;;  %v1004_v18 = vadd.f32 %v1002_v44, %v988_v60 }
 0x29e   : > { %v1010_v36 = vpop.permute.xlu1 %1009 }
 0x29f   : > { %v1012_v1 = vadd.f32 %v1010_v36, %v1004_v18  ;;  %v1013_v20 = vadd.f32 %v1010_v36, %v1005_v17 }
 0x2a1   : > { %v1414_v6 = vadd.f32 %v1410_v55, %v1013_v20  ;;  %v1413_v21 = vadd.f32 %v1409_v30, %v1012_v1 }
 0x2a3   : > { %v1417_v7 = vrot.slane %v1414_v6, 4 }
 0x2a5   : > { %v1418_v10 = vsel %vm553_vm0, %v1413_v21, %v1417_v7 }
 0x2a6   : > { %v1419_v16 = vrot.slane %v1418_v10, 6 }
 0x2a8   : > { %1421 = vst [vmem:[%s2578_s23] sm:$0xcc] %v1419_v16 }
 0x2a9   : > { %1824 = shalt.err (!%p1821_p9)
}
 0x2aa   : > { %1582 = dma.vmem_to_hbm [thread:$0]  (%p2056_p13), %s1437_s14, 128, %s1439_s28, %s1423_s20  }
 0x2ab PF: > { %s1450_s23 = sand.u32 1, %s1859_s29   ;;  %p2670_p10 = scmp.ge.s32.totalorder %s1871_s16, 2 }
 0x2ac   : > { %s1451_s25 = scalar_lea.sflag [#allocation4], %s1450_s23 }
 0x2ad   : > { %p1599_p11 = pnand %p2670_p10, %p2061_p4 }
 0x2af   : > { %p1600_p0 = pneg %p1599_p11 }
 0x2b1   : > { %1854 = dma.done.wait (%p1600_p0), %s1451_s25, 128  }
 0x2b2   : > { %1856 = vsyncadd (%p1600_p0), %s1451_s25, 4294967168  ;;  %s2671_s16 = sld [smem:[#allocation16_spill]]  ;;  %s2674_s29 = smov %s1863_s30 }
 0x2b3   : > { %s2672_s3 = sld [smem:[#allocation15_spill]] }
 0x2b4   : > { %s2673_s15 = sld [smem:[#allocation17_spill]] }
 0x2b8   : > { %p29_p2 = scmp.ge.s32.totalorder %s2671_s16, 4  }
 0x2b9   : > { %s2675_s30 = smov %s2672_s3 }
 0x2ba   :  { %31 = sbr.rel (!%p29_p2) target bundleno = 12 (0xc), region = 173 }
 0x2bf   :  { %1457 = vsyncpa [#allocation3], 1 }
 0x2c0   :  { %1459 = vsyncpa [#allocation3 + $0x1], 1 }
 0x2c1   :  { %1460 = vsyncpa [#allocation6], 1 }
 0x2c2   :  { %1461 = vsyncpa [#allocation9], 1 }
 0x2c3   :  { %1462 = vsyncpa [#allocation4], 1 }
 0x2c4   :  { %1464 = vsyncpa [#allocation4 + $0x1], 1 }

</bundles_post_ra>
